<compile_context>
chip_gen: v5e
topology: v5e:2x2
jax: 0.10.0
libtpu: 0.0.40
codegen_flags: <defaults>
</compile_context>

<pallas_src>
import functools

import jax
import jax.numpy as jnp
from jax.experimental import pallas as pl
from jax.experimental.pallas import tpu as pltpu


# ----------------------------------------------------------------------------
# Pallas kernel
# ----------------------------------------------------------------------------
def _conv2d_leaky_kernel(x_ref, w_ref, b_ref, o_ref, patches_ref, *xpad_scratch,
                         kh, kw, sh, sw, ph, pw, slope):
    """Fused Conv2d + bias + LeakyReLU.

    Grid = (N, Cout_tiles); Cout is the innermost ("arbitrary") axis, so the
    im2col patches built at j == 0 stay valid for every Cout tile of the same
    batch element.

    x_ref:        (1, H, W, Cin)       bf16 input (same block for every j ->
                                       DMA'd only when n changes)
    w_ref:        (Kdim, tco)          bf16 im2col weights for this Cout tile
    b_ref:        (1, tco)             f32 bias (zero on padded lanes)
    o_ref:        (1, Ho, Wo, tco)     f32 output tile
    patches_ref:  (Ho*Wo, Kdim)        bf16 persistent im2col scratch
    xpad_scratch: ((1, Hp, Wp, Cin),)  bf16 halo scratch (only when padding > 0)
    """
    _, H, W, Cin = x_ref.shape
    _, Ho, Wo, tco = o_ref.shape
    HoWo, Kdim = patches_ref.shape

    # ---- Build halo + im2col patches once per batch element (j == 0). ----
    @pl.when(pl.program_id(1) == 0)
    def _build_patches():
        if xpad_scratch:
            xpad_ref = xpad_scratch[0]
            _, Hp, Wp, _ = xpad_ref.shape
            # Zero only the halo border; the interior is overwritten below.
            if ph > 0:
                zrow = jnp.zeros((1, ph, Wp, Cin), xpad_ref.dtype)
                xpad_ref[:, 0:ph, :, :] = zrow
                xpad_ref[:, ph + H:, :, :] = zrow
            if pw > 0:
                zcol = jnp.zeros((1, H, pw, Cin), xpad_ref.dtype)
                xpad_ref[:, ph:ph + H, 0:pw, :] = zcol
                xpad_ref[:, ph:ph + H, pw + W:, :] = zcol
            xpad_ref[:, ph:ph + H, pw:pw + W, :] = x_ref[...]
            xp = xpad_ref[...]
        else:
            xp = x_ref[...]
        # im2col: the kh*kw taps concatenated along channels -> one
        # (HoWo, Kdim) slab written to scratch and reused by every Cout tile,
        # so the conv is a single MXU matmul with K = kh*kw*Cin per tile.
        taps = []
        for dh in range(kh):
            for dw in range(kw):
                taps.append(xp[:, dh:dh + sh * (Ho - 1) + 1:sh,
                                dw:dw + sw * (Wo - 1) + 1:sw, :])
        patches_ref[...] = jnp.concatenate(taps, axis=-1).reshape(HoWo, Kdim)

    # ---- Per-Cout-tile work: one MXU matmul + bias + LeakyReLU. ----
    acc = jnp.dot(patches_ref[...], w_ref[...],
                  preferred_element_type=jnp.float32)
    y = acc + b_ref[...]                      # conv bias (f32)
    y = jnp.where(y >= 0, y, slope * y)       # LeakyReLU(0.01) (f32)
    o_ref[...] = y.reshape(1, Ho, Wo, tco).astype(o_ref.dtype)


# ----------------------------------------------------------------------------
# Wrapper
# ----------------------------------------------------------------------------
def _pair(v):
    return (v, v) if isinstance(v, int) else tuple(v)


def _round_up(v, m):
    return ((v + m - 1) // m) * m


def _is_v5e():
    try:
        kind = jax.devices()[0].device_kind.lower()
    except Exception:
        return False
    return ("v5e" in kind) or ("v5 lite" in kind) or ("v5litepod" in kind)


def _vmem_limit_bytes(H, W, Hp, Wp, Ho, Wo, Cin, Kdim, tco, padded):
    bf16, f32 = 2, 4
    x_blk = H * W * Cin * bf16
    w_blk = Kdim * tco * bf16
    b_blk = tco * f32
    o_blk = Ho * Wo * tco * f32
    patches = Ho * Wo * Kdim * bf16
    xpad = Hp * Wp * Cin * bf16 if padded else 0
    est = 2 * (x_blk + w_blk + b_blk + o_blk)      # double-buffered pipeline blocks
    est += patches + xpad                          # single-buffered scratch
    est += patches + (4 << 20)                     # concat temp + compiler headroom
    try:
        cap = getattr(pltpu.get_tpu_info(), "vmem_capacity_bytes", None)
    except Exception:
        cap = None
    if not cap:
        cap = 128 << 20                            # v5e/v6e; v7x reports 64 MiB itself
    return max(4 << 20, min(est, int(cap * 0.72)))


def hdtr_nonorm_conv2d(x_nchw, w_pt, b, *, kernel_size=3, stride=1, padding=1,
                       slope=0.01):
    """Matches HDTR_nonorm_Conv2d.forward: LeakyReLU(0.01)(Conv2d(x))."""
    N, Cin, H, W = x_nchw.shape
    Cout, Cin_w, KH, KW = w_pt.shape
    assert Cin == Cin_w
    kh, kw = _pair(kernel_size)
    assert (kh, kw) == (KH, KW)
    sh, sw = _pair(stride)
    ph, pw = _pair(padding)
    Ho = (H + 2 * ph - KH) // sh + 1
    Wo = (W + 2 * pw - KW) // sw + 1
    Hp, Wp = H + 2 * ph, W + 2 * pw
    padded = (ph > 0) or (pw > 0)

    # NHWC activations, bf16 operands for the MXU.
    # TODO(synk): in the full HDTR model keep activations NHWC end-to-end so
    # these boundary transposes (one HBM pass each) disappear.
    x = jnp.transpose(x_nchw, (0, 2, 3, 1)).astype(jnp.bfloat16)

    # (Cout, Cin, KH, KW) -> (KH*KW*Cin, Cout) im2col weights; pad Cout to a
    # 128-lane multiple (zero weight columns / zero bias) so output stores are
    # lane-dense unmasked vst.
    Kdim = KH * KW * Cin
    Cout_pad = _round_up(Cout, 128)
    w = jnp.transpose(w_pt, (2, 3, 1, 0)).reshape(Kdim, Cout)
    w = jnp.pad(w, ((0, 0), (0, Cout_pad - Cout))).astype(jnp.bfloat16)
    bias = jnp.pad(b, (0, Cout_pad - Cout)).reshape(1, Cout_pad).astype(jnp.float32)

    # 256-wide Cout tiles only help on 256-wide MXUs (v6e/v7x); on v5e they
    # just double the resident f32 output block.
    tco = 256 if (Cout_pad % 256 == 0 and not _is_v5e()) else 128
    grid = (N, Cout_pad // tco)

    scratch_shapes = [pltpu.VMEM((Ho * Wo, Kdim), jnp.bfloat16)]   # im2col patches
    if padded:
        scratch_shapes.append(pltpu.VMEM((1, Hp, Wp, Cin), jnp.bfloat16))  # halo

    kernel = functools.partial(_conv2d_leaky_kernel, kh=KH, kw=KW, sh=sh, sw=sw,
                               ph=ph, pw=pw, slope=slope)

    # TODO(synk): for large H,W (v7x's 64 MiB VMEM) add an Ho row-block grid
    # axis with a halo-overlapping input window (pl.Element / manual DMA); not
    # needed at HDTR crop resolutions.
    out = pl.pallas_call(
        kernel,
        out_shape=jax.ShapeDtypeStruct((N, Ho, Wo, Cout_pad), jnp.float32),
        grid=grid,
        in_specs=[
            pl.BlockSpec((1, H, W, Cin), lambda n, j: (n, 0, 0, 0)),
            pl.BlockSpec((Kdim, tco), lambda n, j: (0, j)),
            pl.BlockSpec((1, tco), lambda n, j: (0, j)),
        ],
        out_specs=pl.BlockSpec((1, Ho, Wo, tco), lambda n, j: (n, 0, 0, j)),
        scratch_shapes=scratch_shapes,
        compiler_params=pltpu.CompilerParams(
            # Batch is "parallel" (megacore split); Cout must be the innermost
            # "arbitrary" axis so the j == 0 patch-build guard is valid per core.
            dimension_semantics=("parallel", "arbitrary"),
            vmem_limit_bytes=_vmem_limit_bytes(H, W, Hp, Wp, Ho, Wo,
                                               Cin, Kdim, tco, padded),
        ),
    )(x, w, bias)

    out = out[..., :Cout]                        # drop padded output lanes
    return jnp.transpose(out, (0, 3, 1, 2))      # NHWC -> NCHW


# ----------------------------------------------------------------------------
# Pure-JAX reference (same bf16 operand precision, f32 accumulation)
# ----------------------------------------------------------------------------
def _reference(x_nchw, w_pt, b, stride, padding, slope=0.01):
    sh, sw = _pair(stride)
    ph, pw = _pair(padding)
    y = jax.lax.conv_general_dilated(
        x_nchw.astype(jnp.bfloat16), w_pt.astype(jnp.bfloat16),
        window_strides=(sh, sw),
        padding=[(ph, ph), (pw, pw)],
        dimension_numbers=("NCHW", "OIHW", "NCHW"),
        preferred_element_type=jnp.float32)
    y = y + b.reshape(1, -1, 1, 1).astype(jnp.float32)
    return jnp.where(y >= 0, y, slope * y)


# ----------------------------------------------------------------------------
if __name__ == "__main__":
    key = jax.random.PRNGKey(0)
    kx, kw_, kb = jax.random.split(key, 3)

    # Shapes consistent with the module: Conv2d(4, 32, 3, 1, 1) + LeakyReLU(0.01)
    # on a (2, 4, 16, 16) input.
    N, Cin, H, W = 2, 4, 16, 16
    Cout, K, S, P = 32, 3, 1, 1

    bound = 1.0 / (Cin * K * K) ** 0.5          # PyTorch Conv2d default init
    x = jax.random.normal(kx, (N, Cin, H, W), jnp.float32)
    w = jax.random.uniform(kw_, (Cout, Cin, K, K), jnp.float32, -bound, bound)
    b = jax.random.uniform(kb, (Cout,), jnp.float32, -bound, bound)

    y = hdtr_nonorm_conv2d(x, w, b, kernel_size=K, stride=S, padding=P)
    y = jax.block_until_ready(y)

    assert y.shape == (N, Cout, H, W), y.shape
    assert bool(jnp.all(jnp.isfinite(y)))

    y_ref = _reference(x, w, b, S, P)
    err = float(jnp.max(jnp.abs(y - y_ref)))
    assert err < 2e-2, f"max abs error {err}"

    print("KERNEL_OK")
</pallas_src>

<mosaic_0001>
module attributes {stable_mosaic.version = 11 : i64} {
  func.func @_conv2d_leaky_kernel(%arg0: i32, %arg1: i32, %arg2: memref<1x16x16x4xbf16, #tpu.memory_space<vmem>>, %arg3: memref<36x128xbf16, #tpu.memory_space<vmem>>, %arg4: memref<1x128xf32, #tpu.memory_space<vmem>>, %arg5: memref<1x16x16x128xf32, #tpu.memory_space<vmem>>, %arg6: memref<256x36xbf16, #tpu.memory_space<vmem>>, %arg7: memref<1x18x18x4xbf16, #tpu.memory_space<vmem>>) attributes {dimension_semantics = [#tpu.dimension_semantics<parallel>, #tpu.dimension_semantics<arbitrary>], iteration_bounds = array<i64: 2, 1>, scalar_prefetch = 0 : i64, scratch_operands = 2 : i64, tpu.core_type = #tpu.core_type<tc>, window_params = [{transform_indices = @transform_0, window_bounds = array<i64: 1, 16, 16, 4>}, {transform_indices = @transform_1, window_bounds = array<i64: 36, 128>}, {transform_indices = @transform_2, window_bounds = array<i64: 1, 128>}, {transform_indices = @transform_3, window_bounds = array<i64: 1, 16, 16, 128>}]} {
    %c0_i32 = arith.constant 0 : i32
    %0 = arith.cmpi eq, %arg1, %c0_i32 : i32
    %1 = arith.extui %0 : i1 to i32
    %c0_i32_0 = arith.constant 0 : i32
    %2 = arith.cmpi ne, %1, %c0_i32_0 : i32
    scf.if %2 {
      %cst_12 = arith.constant 0.000000e+00 : bf16
      %16 = vector.broadcast %cst_12 : bf16 to vector<1x1x18x4xbf16>
      %c0_13 = arith.constant 0 : index
      %c0_14 = arith.constant 0 : index
      %c0_15 = arith.constant 0 : index
      %c0_16 = arith.constant 0 : index
      %17 = vector.load %arg7[%c0_13, %c0_14, %c0_15, %c0_16] : memref<1x18x18x4xbf16, #tpu.memory_space<vmem>>, vector<1x1x18x4xbf16>
      tpu.vector_store %arg7[%c0_13, %c0_14, %c0_15, %c0_16], %16 {strides = array<i32>} : memref<1x18x18x4xbf16, #tpu.memory_space<vmem>>, vector<1x1x18x4xbf16>,
      %c0_17 = arith.constant 0 : index
      %c17 = arith.constant 17 : index
      %c0_18 = arith.constant 0 : index
      %c0_19 = arith.constant 0 : index
      %18 = vector.load %arg7[%c0_17, %c17, %c0_18, %c0_19] : memref<1x18x18x4xbf16, #tpu.memory_space<vmem>>, vector<1x1x18x4xbf16>
      tpu.vector_store %arg7[%c0_17, %c17, %c0_18, %c0_19], %16 {strides = array<i32>} : memref<1x18x18x4xbf16, #tpu.memory_space<vmem>>, vector<1x1x18x4xbf16>,
      %cst_20 = arith.constant 0.000000e+00 : bf16
      %19 = vector.broadcast %cst_20 : bf16 to vector<1x16x1x4xbf16>
      %c0_21 = arith.constant 0 : index
      %c1 = arith.constant 1 : index
      %c0_22 = arith.constant 0 : index
      %c0_23 = arith.constant 0 : index
      %20 = vector.load %arg7[%c0_21, %c1, %c0_22, %c0_23] : memref<1x18x18x4xbf16, #tpu.memory_space<vmem>>, vector<1x16x1x4xbf16>
      tpu.vector_store %arg7[%c0_21, %c1, %c0_22, %c0_23], %19 {strides = array<i32>} : memref<1x18x18x4xbf16, #tpu.memory_space<vmem>>, vector<1x16x1x4xbf16>,
      %c0_24 = arith.constant 0 : index
      %c1_25 = arith.constant 1 : index
      %c17_26 = arith.constant 17 : index
      %c0_27 = arith.constant 0 : index
      %21 = vector.load %arg7[%c0_24, %c1_25, %c17_26, %c0_27] : memref<1x18x18x4xbf16, #tpu.memory_space<vmem>>, vector<1x16x1x4xbf16>
      tpu.vector_store %arg7[%c0_24, %c1_25, %c17_26, %c0_27], %19 {strides = array<i32>} : memref<1x18x18x4xbf16, #tpu.memory_space<vmem>>, vector<1x16x1x4xbf16>,
      %c0_28 = arith.constant 0 : index
      %c0_29 = arith.constant 0 : index
      %c0_30 = arith.constant 0 : index
      %c0_31 = arith.constant 0 : index
      %22 = vector.load %arg2[%c0_28, %c0_29, %c0_30, %c0_31] : memref<1x16x16x4xbf16, #tpu.memory_space<vmem>>, vector<1x16x16x4xbf16>
      %c0_32 = arith.constant 0 : index
      %c1_33 = arith.constant 1 : index
      %c1_34 = arith.constant 1 : index
      %c0_35 = arith.constant 0 : index
      %23 = vector.load %arg7[%c0_32, %c1_33, %c1_34, %c0_35] : memref<1x18x18x4xbf16, #tpu.memory_space<vmem>>, vector<1x16x16x4xbf16>
      tpu.vector_store %arg7[%c0_32, %c1_33, %c1_34, %c0_35], %22 {strides = array<i32>} : memref<1x18x18x4xbf16, #tpu.memory_space<vmem>>, vector<1x16x16x4xbf16>,
      %c0_36 = arith.constant 0 : index
      %c0_37 = arith.constant 0 : index
      %c0_38 = arith.constant 0 : index
      %c0_39 = arith.constant 0 : index
      %24 = vector.load %arg7[%c0_36, %c0_37, %c0_38, %c0_39] : memref<1x18x18x4xbf16, #tpu.memory_space<vmem>>, vector<1x18x18x4xbf16>
      %25 = vector.extract_strided_slice %24 {offsets = [0, 0, 0, 0], sizes = [1, 16, 16, 4], strides = [1, 1, 1, 1]} : vector<1x18x18x4xbf16> to vector<1x16x16x4xbf16>
      %26 = vector.extract_strided_slice %24 {offsets = [0, 0, 1, 0], sizes = [1, 16, 16, 4], strides = [1, 1, 1, 1]} : vector<1x18x18x4xbf16> to vector<1x16x16x4xbf16>
      %27 = vector.extract_strided_slice %24 {offsets = [0, 0, 2, 0], sizes = [1, 16, 16, 4], strides = [1, 1, 1, 1]} : vector<1x18x18x4xbf16> to vector<1x16x16x4xbf16>
      %28 = vector.extract_strided_slice %24 {offsets = [0, 1, 0, 0], sizes = [1, 16, 16, 4], strides = [1, 1, 1, 1]} : vector<1x18x18x4xbf16> to vector<1x16x16x4xbf16>
      %29 = vector.extract_strided_slice %24 {offsets = [0, 1, 1, 0], sizes = [1, 16, 16, 4], strides = [1, 1, 1, 1]} : vector<1x18x18x4xbf16> to vector<1x16x16x4xbf16>
      %30 = vector.extract_strided_slice %24 {offsets = [0, 1, 2, 0], sizes = [1, 16, 16, 4], strides = [1, 1, 1, 1]} : vector<1x18x18x4xbf16> to vector<1x16x16x4xbf16>
      %31 = vector.extract_strided_slice %24 {offsets = [0, 2, 0, 0], sizes = [1, 16, 16, 4], strides = [1, 1, 1, 1]} : vector<1x18x18x4xbf16> to vector<1x16x16x4xbf16>
      %32 = vector.extract_strided_slice %24 {offsets = [0, 2, 1, 0], sizes = [1, 16, 16, 4], strides = [1, 1, 1, 1]} : vector<1x18x18x4xbf16> to vector<1x16x16x4xbf16>
      %33 = vector.extract_strided_slice %24 {offsets = [0, 2, 2, 0], sizes = [1, 16, 16, 4], strides = [1, 1, 1, 1]} : vector<1x18x18x4xbf16> to vector<1x16x16x4xbf16>
      %34 = tpu.concatenate %25, %26, %27, %28, %29, %30, %31, %32, %33 in 3 : vector<1x16x16x4xbf16>, vector<1x16x16x4xbf16>, vector<1x16x16x4xbf16>, vector<1x16x16x4xbf16>, vector<1x16x16x4xbf16>, vector<1x16x16x4xbf16>, vector<1x16x16x4xbf16>, vector<1x16x16x4xbf16>, vector<1x16x16x4xbf16> -> vector<1x16x16x36xbf16>
      %35 = vector.shape_cast %34 : vector<1x16x16x36xbf16> to vector<256x36xbf16>
      %c0_40 = arith.constant 0 : index
      %c0_41 = arith.constant 0 : index
      %36 = vector.load %arg6[%c0_40, %c0_41] : memref<256x36xbf16, #tpu.memory_space<vmem>>, vector<256x36xbf16>
      tpu.vector_store %arg6[%c0_40, %c0_41], %35 {strides = array<i32>} : memref<256x36xbf16, #tpu.memory_space<vmem>>, vector<256x36xbf16>,
    } else {
    }
    %c0 = arith.constant 0 : index
    %c0_1 = arith.constant 0 : index
    %3 = vector.load %arg6[%c0, %c0_1] : memref<256x36xbf16, #tpu.memory_space<vmem>>, vector<256x36xbf16>
    %c0_2 = arith.constant 0 : index
    %c0_3 = arith.constant 0 : index
    %4 = vector.load %arg3[%c0_2, %c0_3] : memref<36x128xbf16, #tpu.memory_space<vmem>>, vector<36x128xbf16>
    %cst = arith.constant dense<0.000000e+00> : vector<256x128xf32>
    %5 = tpu.matmul %3, %4, %cst {dimension_numbers = #tpu.dot_dimension_numbers<[1], [0], [0], [1], [0, 0, 1, 1], [], []>} : vector<256x36xbf16>, vector<36x128xbf16>, vector<256x128xf32> -> vector<256x128xf32>
    %c0_4 = arith.constant 0 : index
    %c0_5 = arith.constant 0 : index
    %6 = vector.load %arg4[%c0_4, %c0_5] : memref<1x128xf32, #tpu.memory_space<vmem>>, vector<1x128xf32>
    %7 = vector.broadcast %6 : vector<1x128xf32> to vector<256x128xf32>
    %8 = arith.addf %5, %7 : vector<256x128xf32>
    %cst_6 = arith.constant 0.000000e+00 : f32
    %9 = vector.broadcast %cst_6 : f32 to vector<256x128xf32>
    %10 = arith.cmpf oge, %8, %9 : vector<256x128xf32>
    %cst_7 = arith.constant 0.00999999977 : f32
    %11 = vector.broadcast %cst_7 : f32 to vector<256x128xf32>
    %12 = arith.mulf %11, %8 : vector<256x128xf32>
    %13 = arith.select %10, %8, %12 : vector<256x128xi1>, vector<256x128xf32>
    %14 = vector.shape_cast %13 : vector<256x128xf32> to vector<1x16x16x128xf32>
    %c0_8 = arith.constant 0 : index
    %c0_9 = arith.constant 0 : index
    %c0_10 = arith.constant 0 : index
    %c0_11 = arith.constant 0 : index
    %15 = vector.load %arg5[%c0_8, %c0_9, %c0_10, %c0_11] : memref<1x16x16x128xf32, #tpu.memory_space<vmem>>, vector<1x16x16x128xf32>
    tpu.vector_store %arg5[%c0_8, %c0_9, %c0_10, %c0_11], %14 {strides = array<i32>} : memref<1x16x16x128xf32, #tpu.memory_space<vmem>>, vector<1x16x16x128xf32>,
    return
  }
  func.func @transform_0(%arg0: i32, %arg1: i32) -> (i32, i32, i32, i32) {
    %c0_i32 = arith.constant 0 : i32
    %c0_i32_0 = arith.constant 0 : i32
    %c0_i32_1 = arith.constant 0 : i32
    %c0_i32_2 = arith.constant 0 : i32
    return %arg0, %c0_i32, %c0_i32_0, %c0_i32_1 : i32, i32, i32, i32
  }
  func.func @transform_1(%arg0: i32, %arg1: i32) -> (i32, i32) {
    %c0_i32 = arith.constant 0 : i32
    %c0_i32_0 = arith.constant 0 : i32
    return %c0_i32, %arg1 : i32, i32
  }
  func.func @transform_2(%arg0: i32, %arg1: i32) -> (i32, i32) {
    %c0_i32 = arith.constant 0 : i32
    %c0_i32_0 = arith.constant 0 : i32
    return %c0_i32, %arg1 : i32, i32
  }
  func.func @transform_3(%arg0: i32, %arg1: i32) -> (i32, i32, i32, i32) {
    %c0_i32 = arith.constant 0 : i32
    %c0_i32_0 = arith.constant 0 : i32
    %c0_i32_1 = arith.constant 0 : i32
    return %arg0, %c0_i32, %c0_i32_0, %arg1 : i32, i32, i32, i32
  }
}

</mosaic_0001>

<bundles_post_ra>
// kernel: tpu_custom_call.1
= control target key start
LH: loop header
LB: loop body
LE: loop exit
PB: predicated region body
PF: predicated region fallthrough
CT: control target
= control target key end

     0   :  { %8 = vsyncpa [#allocation5], 0  ;;  %s4096_s0 = inlined_call_operand.vmem [shape: bf16[2,16,16,4], index: 0, kind: input, shape index: {}]   ;;  %s4097_s1 = inlined_call_operand.vmem [shape: bf16[36,128], index: 1, kind: input, shape index: {}]   ;;  %s4098_s2 = inlined_call_operand.vmem [shape: f32[1,128], index: 2, kind: input, shape index: {}]   ;;  %s4099_s3 = inlined_call_operand.hbm [shape: f32[2,16,16,128], index: 3, kind: output, shape index: {}]  }
   0x1   :  { %10 = vsyncpa [#allocation5 + $0x1], 0  ;;  %s2861_s12 = smov 0   ;;  %s2863_s13 = smov 0  }
   0x2   :  { %s2865_s14 = smov 0   ;;  %s2867_s15 = smov 0  }
   0x3   :  { %s2869_s16 = smov 0   ;;  %s2871_s17 = smov 0  }
   0x4 LB: > { %s2455_s18 = sadd.s32 4294967295, %s2829_s17   ;;  %s2456_s19 = sadd.s32 4294967294, %s2829_s17   ;;  %s2829_s17 = sphi %s2871_s17, %s16_s17   ;;  %s2825_s16 = sphi %s2869_s16, %s4129_s16   ;;  %s2821_s15 = sphi %s2867_s15, %s4128_s15   ;;  %s2817_s14 = sphi %s2865_s14, %s4127_s14   ;;  %s2813_s13 = sphi %s2863_s13, %s4126_s13   ;;  %s2809_s12 = sphi %s2861_s12, %s4125_s12  }
   0x5   : > { %s28_s20 = sadd.s32 1, %s2825_s16  ;;  %s115_s21 = sadd.s32 1, %s2817_s14 }
   0x6   : > { %p30_p0 = scmp.ge.s32.totalorder %s28_s20, 2  ;;  %p125_p1 = scmp.ne.s32.totalorder %s2817_s14, %s2813_s13 }
   0x7   : > { %p126_p2 = scmp.eq.s32.totalorder %s2455_s18, 1  ;;  %p131_p3 = scmp.ne.s32.totalorder %s2813_s13, %s2809_s12 }
   0x8   : > { %s4131_s20 = smov (%p30_p0, %s28_s20), 0  ;;  %p132_p5 = scmp.eq.s32.totalorder %s2456_s19, 1 }
   0x9   : > { %p2901_p4 = por %p126_p2, %p125_p1  ;;  %s110_s23 = ssub.s32 %s2825_s16, %s4131_s20 }
   0xa   : > { %p2461_p6 = scmp.ge.s32.totalorder %s2829_s17, 1  ;;  %p113_p7 = scmp.eq.s32.totalorder %s110_s23, 0 }
   0xb   : > { %p2908_p8 = por %p132_p5, %p131_p3  ;;  %p171_p9 = scmp.lt.s32.totalorder %s2829_s17, 3 }
   0xc   : > { %s2914_s25 = scalar_select %p113_p7, %s2817_s14, %s115_s21  }
   0xd   : > { %p172_p10 = pnand %p2461_p6, %p171_p9 }
   0xf   : > { %175 = sbr.rel (%p172_p10) target bundleno = 718 (0x2ce), region = 32 }
  0x14   : > { %vm219_vm0 = vcmask 27648   ;;  %vm222_vm1 = vcmask 24576   ;;  %vm230_vm2 = vsmask.f32 256  ;;  %v2831_v0 = vmov 0   ;;  %p202_p11 = scmp.lt.s32.totalorder %s2821_s15, 1 }
  0x15   : > { %220 = vst.msk [vmem:[#allocation3] sm:$0xf] %vm219_vm0, %v2831_v0  ;;  %vm2919_vm3 = vmand %vm222_vm1, %vm230_vm2  ;;  %vm280_vm4 = vsmask.f32 7938  ;;  %v241_v3 = vld [vmem:[#allocation3 + $0x30] sm:$0x1] }
  0x16   : > { %221 = vst.msk [vmem:[#allocation3 + $0x4] sm:$0xf] %vm219_vm0, %v2831_v0  ;;  %vm2926_vm5 = vmand %vm222_vm1, %vm280_vm4  ;;  %v291_v4 = vld [vmem:[#allocation3 + $0x38] sm:$0x1]  ;;  %s203_s26 = scalar_select %p202_p11, %s2821_s15, 1  ;;  %v242_v5 = vsel %vm2919_vm3, 0, %v241_v3 }
  0x17   : > { %223 = vst.msk [vmem:[#allocation3 + $0x8] sm:$0x1] %vm222_vm1, %v2831_v0  ;;  %v292_v6 = vsel %vm2926_vm5, 0, %v291_v4  ;;  %v235_v7 = vld [vmem:[#allocation3 + $0x18] sm:$0x1]  ;;  %vm2954_vm8 = vmand %vm219_vm0, %vm280_vm4  ;;  %s2832_s4 = smov 4  }
  0x18   : > { %225 = vst.msk [vmem:[#allocation3 + $0xcc] sm:$0xf] %vm219_vm0, %v2831_v0  ;;  %v285_v8 = vld [vmem:[#allocation3 + $0x20] sm:$0x1]  ;;  %s2630_s27 = sshll.u32 %s203_s26, 7  ;;  %v236_v9 = vsel %vm2919_vm3, 0, %v235_v7 }
  0x19   : > { %226 = vst.msk [vmem:[#allocation3 + $0xd0] sm:$0xf] %vm219_vm0, %v2831_v0  ;;  %vm362_vm6 = vsmask.f32 4368  ;;  %s2943_s30 = scalar_lea.vmem %s4096_s0, %s2630_s27  ;;  %v286_v10 = vsel %vm2926_vm5, 0, %v285_v8  ;;  %vm1205_vm10 = vcmask 1046528  }
  0x1a   : > { %227 = vst.msk [vmem:[#allocation3 + $0xd4] sm:$0x1] %vm222_vm1, %v2831_v0  ;;  %v232_v11 = vld [vmem:[#allocation3 + $0xc] sm:$0x1]  ;;  %vm980_vm7 = vsmask.f32 7424  ;;  %vm2965_vm9 = vmor %vm230_vm2, %vm362_vm6 }
  0x1b   : > { %243 = vst [vmem:[#allocation3 + $0x30] sm:$0x1] %v242_v5  ;;  %v336_v12 = vld [vmem:[%s2943_s30 + $0x18] sm:$0xf]  ;;  %v337_v13 = vld [vmem:[%s2943_s30 + $0x1c] sm:$0xf] }
  0x1c   : > { %293 = vst [vmem:[#allocation3 + $0x38] sm:$0x1] %v292_v6  ;;  %v416_v15 = vshrl.u32 %v336_v12, 16  ;;  %v419_v16 = vshll.u32 %v336_v12, 16  ;;  %v424_v17 = vshrl.u32 %v337_v13, 16  ;;  %v427_v18 = vshll.u32 %v337_v13, 16 }
  0x1d   : > { %v2631_v14 = vld [vmem:[#allocation3] sm:$0xff]  ;;  %237 = vst [vmem:[#allocation3 + $0x18] sm:$0x1] %v236_v9  ;;  %v332_v20 = vld [vmem:[%s2943_s30 + $0x8] sm:$0xf]  ;;  %v233_v30 = vsel %vm2919_vm3, 0, %v232_v11 }
  0x1e   : > { %v800_v19 = vld [vmem:[#allocation3 + $0x8] sm:$0x1]  ;;  %v982_v22 = vshrl.u32 %v2631_v14, 16  ;;  %v984_v23 = vshll.u32 %v2631_v14, 16  ;;  %v418_v24 = vrot.slane %v416_v15, 7  ;;  %v426_v26 = vrot.slane %v424_v17, 7 }
  0x1f   : > { %v948_v21 = vunpack.c.l.b16 %v800_v19  ;;  %287 = vst [vmem:[#allocation3 + $0x20] sm:$0x1] %v286_v10  ;;  %v333_v27 = vld [vmem:[%s2943_s30 + $0xc] sm:$0xf]  ;;  %v382_v28 = vshrl.u32 %v332_v20, 16  ;;  %v385_v29 = vshll.u32 %v332_v20, 16 }
  0x20   : > { %v986_v32 = vrot.slane %v984_v23, 1  ;;  %v421_v34 = vor.u32 %v419_v16, %v418_v24  ;;  %v422_v35 = vrot.slane %v418_v24, 4  ;;  %234 = vst [vmem:[#allocation3 + $0xc] sm:$0x1] %v233_v30  ;;  %v282_v36 = vld [vmem:[#allocation3 + $0x14] sm:$0x1]  ;;  %v429_v38 = vor.u32 %v427_v18, %v426_v26 }
  0x21   : > { %v2961_v31 = vpack.c.b16 %v948_v21, %v948_v21  ;;  %v330_v37 = vld [vmem:[%s2943_s30] sm:$0xf]  ;;  %v431_v39 = vrot.slane %v426_v26, 4  ;;  %v384_v41 = vrot.slane %v382_v28, 7  ;;  %v390_v42 = vshrl.u32 %v333_v27, 16  ;;  %s2833_s5 = smov 8  }
  0x22   : > { %v707_v40 = vld [vmem:[#allocation3 + $0x30] sm:$0xf]  ;;  %v987_v43 = vor.u32 %v986_v32, %v982_v22  ;;  %v393_v47 = vshll.u32 %v333_v27, 16  ;;  %v331_v48 = vld [vmem:[%s2943_s30 + $0x4] sm:$0xf]  ;;  %v430_v49 = vsel %vm2965_vm9, %v422_v35, %v429_v38  ;;  %v283_v59 = vsel %vm2926_vm5, 0, %v282_v36 }
  0x23   : > { %v989_v44 = vshll.u32 %v2961_v31, 16  ;;  %v708_v45 = vsel %vm2954_vm8, %v421_v34, %v707_v40  ;;  %v711_v46 = vld [vmem:[#allocation3 + $0x38] sm:$0x1]  ;;  %v387_v51 = vor.u32 %v385_v29, %v384_v41  ;;  %v388_v52 = vrot.slane %v384_v41, 4  ;;  %v244_v53 = vld [vmem:[#allocation3 + $0x3c] sm:$0x1] }
  0x24   : > { %709 = vst [vmem:[#allocation3 + $0x30] sm:$0xf] %v708_v45  ;;  %v712_v50 = vsel %vm2919_vm3, %v431_v39, %v711_v46  ;;  %v392_v55 = vrot.slane %v390_v42, 7  ;;  %v693_v56 = vld [vmem:[#allocation3 + $0x18] sm:$0xf]  ;;  %v365_v60 = vshrl.u32 %v330_v37, 16 }
  0x25   : > { %v991_v54 = vrot.slane %v989_v44, 1  ;;  %710 = vst.msk [vmem:[#allocation3 + $0x34] sm:$0xf] %vm219_vm0, %v430_v49  ;;  %v694_v57 = vsel %vm2954_vm8, %v387_v51, %v693_v56  ;;  %v368_v0 = vshll.u32 %v330_v37, 16  ;;  %v294_v3 = vld [vmem:[#allocation3 + $0x44] sm:$0x1] }
  0x26   : > { %713 = vst [vmem:[#allocation3 + $0x38] sm:$0x1] %v712_v50  ;;  %v697_v58 = vld [vmem:[#allocation3 + $0x20] sm:$0x1]  ;;  %v395_v62 = vor.u32 %v393_v47, %v392_v55  ;;  %v397_v63 = vrot.slane %v392_v55, 4  ;;  %v367_v4 = vrot.slane %v365_v60, 7 }
  0x27   : > { %v992_v61 = vsel %vm980_vm7, %v987_v43, %v991_v54  ;;  %695 = vst [vmem:[#allocation3 + $0x18] sm:$0xf] %v694_v57  ;;  %v373_v5 = vshrl.u32 %v331_v48, 16  ;;  %v376_v6 = vshll.u32 %v331_v48, 16  ;;  %v245_v7 = vsel %vm2919_vm3, 0, %v244_v53  ;;  %s2834_s6 = smov 12  }
  0x28   : > { %1173 = vrot.lane.b32.xlu0 %v992_v61, %s2832_s4  ;;  %284 = vst [vmem:[#allocation3 + $0x14] sm:$0x1] %v283_v59  ;;  %v396_v8 = vsel %vm2965_vm9, %v388_v52, %v395_v62  ;;  %v698_v9 = vsel %vm2919_vm3, %v397_v63, %v697_v58  ;;  %v686_v10 = vld [vmem:[#allocation3 + $0xc] sm:$0xf]  ;;  %v295_v11 = vsel %vm2926_vm5, 0, %v294_v3  ;;  %v370_v12 = vor.u32 %v368_v0, %v367_v4  ;;  %s2835_s7 = smov 20  }
  0x29   : > { %246 = vst [vmem:[#allocation3 + $0x3c] sm:$0x1] %v245_v7  ;;  %v371_v13 = vrot.slane %v367_v4, 4  ;;  %v375_v14 = vrot.slane %v373_v5, 7  ;;  %v338_v15 = vld [vmem:[%s2943_s30 + $0x20] sm:$0xf] }
  0x2a   : > { %696 = vst.msk [vmem:[#allocation3 + $0x1c] sm:$0xf] %vm219_vm0, %v396_v8  ;;  %v339_v16 = vld [vmem:[%s2943_s30 + $0x24] sm:$0xf]  ;;  %v433_v17 = vshrl.u32 %v338_v15, 16  ;;  %v436_v18 = vshll.u32 %v338_v15, 16  ;;  %v687_v22 = vsel %vm2954_vm8, %v370_v12, %v686_v10 }
  0x2b   : > { %699 = vst [vmem:[#allocation3 + $0x20] sm:$0x1] %v698_v9  ;;  %v378_v20 = vor.u32 %v376_v6, %v375_v14  ;;  %v380_v21 = vrot.slane %v375_v14, 4  ;;  %v441_v23 = vshrl.u32 %v339_v16, 16  ;;  %v444_v27 = vshll.u32 %v339_v16, 16  ;;  %s2836_s8 = smov 16  }
  0x2c   : > { %v2996_v19 = vld [vmem:[#allocation3 + $0x30] sm:$0xff]  ;;  %296 = vst [vmem:[#allocation3 + $0x44] sm:$0x1] %v295_v11  ;;  %v435_v26 = vrot.slane %v433_v17, 7  ;;  %v238_v34 = vld [vmem:[#allocation3 + $0x24] sm:$0x1] }
  0x2d   : > { %v812_v24 = vld [vmem:[#allocation3 + $0x38] sm:$0x1]  ;;  %688 = vst [vmem:[#allocation3 + $0xc] sm:$0xf] %v687_v22  ;;  %v1030_v29 = vshrl.u32 %v2996_v19, 16  ;;  %v1032_v30 = vshll.u32 %v2996_v19, 16  ;;  %v379_v32 = vsel %vm2965_vm9, %v371_v13, %v378_v20 }
  0x2e   : > { %v952_v28 = vunpack.c.l.b16 %v812_v24  ;;  %v288_v35 = vld [vmem:[#allocation3 + $0x2c] sm:$0x1]  ;;  %689 = vst.msk [vmem:[#allocation3 + $0x10] sm:$0xf] %vm219_vm0, %v379_v32  ;;  %v438_v37 = vor.u32 %v436_v18, %v435_v26  ;;  %v439_v38 = vrot.slane %v435_v26, 4  ;;  %v443_v39 = vrot.slane %v441_v23, 7 }
  0x2f   : > { %v690_v36 = vld [vmem:[#allocation3 + $0x14] sm:$0x1]  ;;  %v1034_v41 = vrot.slane %v1032_v30, 1  ;;  %v239_v44 = vsel %vm2919_vm3, 0, %v238_v34  ;;  %v334_v45 = vld [vmem:[%s2943_s30 + $0x10] sm:$0xf] }
  0x30   : > { %v3005_v40 = vpack.c.b16 %v952_v28, %v952_v28  ;;  %v691_v42 = vsel %vm2919_vm3, %v380_v21, %v690_v36  ;;  %v714_v43 = vld [vmem:[#allocation3 + $0x3c] sm:$0xf]  ;;  %v446_v47 = vor.u32 %v444_v27, %v443_v39  ;;  %v448_v48 = vrot.slane %v443_v39, 4  ;;  %240 = vst [vmem:[#allocation3 + $0x24] sm:$0x1] %v239_v44  ;;  %s2837_s9 = smov 24  }
  0x31   : > { %v3012_v46 = vld [vmem:[#allocation3 + $0x18] sm:$0xff]  ;;  %692 = vst [vmem:[#allocation3 + $0x14] sm:$0x1] %v691_v42  ;;  %v715_v49 = vsel %vm2954_vm8, %v438_v37, %v714_v43  ;;  %v289_v50 = vsel %vm2926_vm5, 0, %v288_v35  ;;  %v1035_v51 = vor.u32 %v1034_v41, %v1030_v29  ;;  %v399_v54 = vshrl.u32 %v334_v45, 16  ;;  %s2838_s10 = smov 32  }
  0x32   : > { %v1037_v52 = vshll.u32 %v3005_v40, 16  ;;  %v806_v53 = vld [vmem:[#allocation3 + $0x20] sm:$0x1]  ;;  %716 = vst [vmem:[#allocation3 + $0x3c] sm:$0xf] %v715_v49  ;;  %v1006_v56 = vshrl.u32 %v3012_v46, 16  ;;  %v447_v58 = vsel %vm2965_vm9, %v439_v38, %v446_v47 }
  0x33   : > { %v950_v55 = vunpack.c.l.b16 %v806_v53  ;;  %v1008_v57 = vshll.u32 %v3012_v46, 16  ;;  %v718_v59 = vld [vmem:[#allocation3 + $0x44] sm:$0x1]  ;;  %717 = vst.msk [vmem:[#allocation3 + $0x40] sm:$0xf] %vm219_vm0, %v447_v58  ;;  %v401_v63 = vrot.slane %v399_v54, 7 }
  0x34   : > { %v1039_v60 = vrot.slane %v1037_v52, 1  ;;  %v719_v61 = vsel %vm2919_vm3, %v448_v48, %v718_v59  ;;  %v335_v62 = vld [vmem:[%s2943_s30 + $0x14] sm:$0xf]  ;;  %v402_v4 = vshll.u32 %v334_v45, 16  ;;  %290 = vst [vmem:[#allocation3 + $0x2c] sm:$0x1] %v289_v50 }
  0x35   : > { %v3027_v0 = vpack.c.b16 %v950_v55, %v950_v55  ;;  %v1010_v3 = vrot.slane %v1008_v57, 1  ;;  %720 = vst [vmem:[#allocation3 + $0x44] sm:$0x1] %v719_v61  ;;  %v407_v5 = vshrl.u32 %v335_v62, 16  ;;  %v3032_v7 = vld [vmem:[#allocation3 + $0xc] sm:$0xff]  ;;  %v405_v8 = vrot.slane %v401_v63, 4 }
  0x36   : > { %v3030_v6 = vsel %vm980_vm7, %v1035_v51, %v1039_v60  ;;  %v410_v9 = vshll.u32 %v335_v62, 16  ;;  %v404_v12 = vor.u32 %v402_v4, %v401_v63  ;;  %v247_v14 = vld [vmem:[#allocation3 + $0x48] sm:$0x1]  ;;  %v297_v15 = vld [vmem:[#allocation3 + $0x50] sm:$0x1]  ;;  %v994_v17 = vshrl.u32 %v3032_v7, 16 }
  0x37   : > { %1181 = vrot.lane.b32.xlu2 %v3030_v6, %s2832_s4  ;;  %v1011_v10 = vor.u32 %v1010_v3, %v1006_v56  ;;  %v1013_v11 = vshll.u32 %v3027_v0, 16  ;;  %v409_v13 = vrot.slane %v407_v5, 7  ;;  %v996_v18 = vshll.u32 %v3032_v7, 16  ;;  %v340_v27 = vld [vmem:[%s2943_s30 + $0x28] sm:$0xf]  ;;  %s2839_s11 = smov 28  }
  0x38   : > { %v803_v16 = vld [vmem:[#allocation3 + $0x14] sm:$0x1]  ;;  %v248_v20 = vsel %vm2919_vm3, 0, %v247_v14  ;;  %v298_v21 = vsel %vm2926_vm5, 0, %v297_v15  ;;  %v700_v29 = vld [vmem:[#allocation3 + $0x24] sm:$0xf] }
  0x39   : > { %v1015_v22 = vrot.slane %v1013_v11, 1  ;;  %v949_v23 = vunpack.c.l.b16 %v803_v16  ;;  %v412_v24 = vor.u32 %v410_v9, %v409_v13  ;;  %v414_v26 = vrot.slane %v409_v13, 4  ;;  %249 = vst [vmem:[#allocation3 + $0x48] sm:$0x1] %v248_v20  ;;  %v341_v38 = vld [vmem:[%s2943_s30 + $0x2c] sm:$0xf] }
  0x3a   : > { %v998_v28 = vrot.slane %v996_v18, 1  ;;  %299 = vst [vmem:[#allocation3 + $0x50] sm:$0x1] %v298_v21  ;;  %v450_v30 = vshrl.u32 %v340_v27, 16  ;;  %v3049_v35 = vld [vmem:[#allocation3 + $0x3c] sm:$0xff]  ;;  %v701_v37 = vsel %vm2954_vm8, %v404_v12, %v700_v29  ;;  %v453_v44 = vshll.u32 %v340_v27, 16 }
  0x3b   : > { %v3045_v32 = vsel %vm980_vm7, %v1011_v10, %v1015_v22  ;;  %v3047_v34 = vpack.c.b16 %v949_v23, %v949_v23  ;;  %v413_v36 = vsel %vm2965_vm9, %v405_v8, %v412_v24  ;;  %v253_v39 = vld [vmem:[#allocation3 + $0x60] sm:$0x1]  ;;  %702 = vst [vmem:[#allocation3 + $0x24] sm:$0xf] %v701_v37  ;;  %v1042_v48 = vshrl.u32 %v3049_v35, 16  ;;  %s199_s28 = sand.u32 1, %s2813_s13  }
  0x3c   : > { %1177 = vrot.lane.b32.xlu1 %v3045_v32, %s2832_s4  ;;  %v999_v41 = vor.u32 %v998_v28, %v994_v17  ;;  %v815_v42 = vld [vmem:[#allocation3 + $0x44] sm:$0x1]  ;;  %v452_v43 = vrot.slane %v450_v30, 7  ;;  %v1044_v49 = vshll.u32 %v3049_v35, 16  ;;  %703 = vst.msk [vmem:[#allocation3 + $0x28] sm:$0xf] %vm219_vm0, %v413_v36 }
  0x3d   : > { %v1001_v45 = vshll.u32 %v3047_v34, 16  ;;  %v953_v47 = vunpack.c.l.b16 %v815_v42  ;;  %v704_v50 = vld [vmem:[#allocation3 + $0x2c] sm:$0x1]  ;;  %v458_v53 = vshrl.u32 %v341_v38, 16  ;;  %v461_v54 = vshll.u32 %v341_v38, 16  ;;  %s2340_s18 = scalar_lea.sflag [#allocation5], %s199_s28 }
  0x3e   : > { %v455_v51 = vor.u32 %v453_v44, %v452_v43  ;;  %v456_v52 = vrot.slane %v452_v43, 4  ;;  %v1046_v57 = vrot.slane %v1044_v49, 1  ;;  %v705_v58 = vsel %vm2919_vm3, %v414_v26, %v704_v50  ;;  %v303_v59 = vld [vmem:[#allocation3 + $0x68] sm:$0x1]  ;;  %v344_v60 = vld [vmem:[%s2943_s30 + $0x38] sm:$0xf] }
  0x3f   : > { %v1003_v55 = vrot.slane %v1001_v45, 1  ;;  %v3062_v56 = vpack.c.b16 %v953_v47, %v953_v47  ;;  %706 = vst [vmem:[#allocation3 + $0x2c] sm:$0x1] %v705_v58  ;;  %v460_v61 = vrot.slane %v458_v53, 7  ;;  %v254_v63 = vsel %vm2919_vm3, 0, %v253_v39  ;;  %s2771_s27 = scalar_lea.hbm %s4099_s3, 512 }
  0x40   : > { %v721_v62 = vld [vmem:[#allocation3 + $0x48] sm:$0xf]  ;;  %v1047_v4 = vor.u32 %v1046_v57, %v1042_v48  ;;  %255 = vst [vmem:[#allocation3 + $0x60] sm:$0x1] %v254_v63  ;;  %v304_v12 = vsel %vm2926_vm5, 0, %v303_v59  ;;  %v484_v15 = vshrl.u32 %v344_v60, 16 }
  0x41   : > { %v3070_v3 = vsel %vm980_vm7, %v999_v41, %v1003_v55  ;;  %v1049_v5 = vshll.u32 %v3062_v56, 16  ;;  %v722_v8 = vsel %vm2954_vm8, %v455_v51, %v721_v62  ;;  %v725_v9 = vld [vmem:[#allocation3 + $0x50] sm:$0x1]  ;;  %v463_v10 = vor.u32 %v461_v54, %v460_v61  ;;  %v345_v13 = vld [vmem:[%s2943_s30 + $0x3c] sm:$0xf] }
  0x42   : > { %1175 = vrot.lane.b32.xlu0 %v3070_v3, %s2832_s4  ;;  %v465_v11 = vrot.slane %v460_v61, 4  ;;  %723 = vst [vmem:[#allocation3 + $0x48] sm:$0xf] %v722_v8  ;;  %v487_v16 = vshll.u32 %v344_v60, 16  ;;  %v492_v17 = vshrl.u32 %v345_v13, 16  ;;  %v495_v22 = vshll.u32 %v345_v13, 16 }
  0x43   : > { %v1051_v14 = vrot.slane %v1049_v5, 1  ;;  %305 = vst [vmem:[#allocation3 + $0x68] sm:$0x1] %v304_v12  ;;  %v3080_v18 = vld [vmem:[#allocation3 + $0x24] sm:$0xff]  ;;  %v464_v20 = vsel %vm2965_vm9, %v456_v52, %v463_v10  ;;  %v250_v23 = vld [vmem:[#allocation3 + $0x54] sm:$0x1] }
  0x44   : > { %v726_v21 = vsel %vm2919_vm3, %v465_v11, %v725_v9  ;;  %v300_v24 = vld [vmem:[#allocation3 + $0x5c] sm:$0x1]  ;;  %724 = vst.msk [vmem:[#allocation3 + $0x4c] sm:$0xf] %vm219_vm0, %v464_v20  ;;  %v486_v27 = vrot.slane %v484_v15, 7  ;;  %v494_v28 = vrot.slane %v492_v17, 7 }
  0x45   : > { %v3087_v26 = vsel %vm980_vm7, %v1047_v4, %v1051_v14  ;;  %v251_v29 = vsel %vm2919_vm3, 0, %v250_v23  ;;  %v1020_v30 = vshll.u32 %v3080_v18, 16  ;;  %727 = vst [vmem:[#allocation3 + $0x50] sm:$0x1] %v726_v21  ;;  %v301_v36 = vsel %vm2926_vm5, 0, %v300_v24 }
  0x46   : > { %4115 = vst [vmem:[#allocation7_spill] sm:$0xff] %v3087_v26  ;;  %1183 = vrot.lane.b32.xlu2 %v3087_v26, %s2832_s4  ;;  %v809_v37 = vld [vmem:[#allocation3 + $0x2c] sm:$0x1]  ;;  %v489_v38 = vor.u32 %v487_v16, %v486_v27  ;;  %v490_v39 = vrot.slane %v486_v27, 4  ;;  %v497_v41 = vor.u32 %v495_v22, %v494_v28  ;;  %v499_v42 = vrot.slane %v494_v28, 4 }
  0x47   : > { %252 = vst [vmem:[#allocation3 + $0x54] sm:$0x1] %v251_v29  ;;  %v951_v43 = vunpack.c.l.b16 %v809_v37  ;;  %v1018_v44 = vshrl.u32 %v3080_v18, 16  ;;  %v1022_v45 = vrot.slane %v1020_v30, 1  ;;  %v735_v47 = vld [vmem:[#allocation3 + $0x60] sm:$0xf] }
  0x48   : > { %302 = vst [vmem:[#allocation3 + $0x5c] sm:$0x1] %v301_v36  ;;  %v498_v48 = vsel %vm2965_vm9, %v490_v39, %v497_v41  ;;  %v736_v49 = vsel %vm2954_vm8, %v489_v38, %v735_v47  ;;  %v342_v50 = vld [vmem:[%s2943_s30 + $0x30] sm:$0xf]  ;;  %v343_v51 = vld [vmem:[%s2943_s30 + $0x34] sm:$0xf] }
  0x49   : > { %v256_v52 = vld [vmem:[#allocation3 + $0x6c] sm:$0x1]  ;;  %v3104_v53 = vpack.c.b16 %v951_v43, %v951_v43  ;;  %737 = vst [vmem:[#allocation3 + $0x60] sm:$0xf] %v736_v49  ;;  %v467_v55 = vshrl.u32 %v342_v50, 16  ;;  %v470_v57 = vshll.u32 %v342_v50, 16  ;;  %v1023_v62 = vor.u32 %v1022_v45, %v1018_v44 }
  0x4a   : > { %v739_v54 = vld [vmem:[#allocation3 + $0x68] sm:$0x1]  ;;  %738 = vst.msk [vmem:[#allocation3 + $0x64] sm:$0xf] %vm219_vm0, %v498_v48  ;;  %v475_v59 = vshrl.u32 %v343_v51, 16  ;;  %v478_v60 = vshll.u32 %v343_v51, 16 }
  0x4b   : > { %v740_v58 = vsel %vm2919_vm3, %v499_v42, %v739_v54  ;;  %v257_v61 = vsel %vm2919_vm3, 0, %v256_v52  ;;  %v1025_v63 = vshll.u32 %v3104_v53, 16  ;;  %v3112_v4 = vld [vmem:[#allocation3 + $0x48] sm:$0xff]  ;;  %v469_v5 = vrot.slane %v467_v55, 7  ;;  %v306_v22 = vld [vmem:[#allocation3 + $0x74] sm:$0x1] }
  0x4c   : > { %741 = vst [vmem:[#allocation3 + $0x68] sm:$0x1] %v740_v58  ;;  %v818_v8 = vld [vmem:[#allocation3 + $0x50] sm:$0x1]  ;;  %v477_v9 = vrot.slane %v475_v59, 7  ;;  %v1054_v12 = vshrl.u32 %v3112_v4, 16 }
  0x4d   : > { %258 = vst [vmem:[#allocation3 + $0x6c] sm:$0x1] %v257_v61  ;;  %v1027_v10 = vrot.slane %v1025_v63, 1  ;;  %v954_v11 = vunpack.c.l.b16 %v818_v8  ;;  %v1056_v13 = vshll.u32 %v3112_v4, 16  ;;  %v472_v15 = vor.u32 %v470_v57, %v469_v5  ;;  %v346_v29 = vld [vmem:[%s2943_s30 + $0x40] sm:$0xf] }
  0x4e   : > { %v728_v14 = vld [vmem:[#allocation3 + $0x54] sm:$0xf]  ;;  %v473_v16 = vrot.slane %v469_v5, 4  ;;  %v480_v17 = vor.u32 %v478_v60, %v477_v9  ;;  %v482_v20 = vrot.slane %v477_v9, 4  ;;  %v307_v28 = vsel %vm2926_vm5, 0, %v306_v22 }
  0x4f   : > { %v732_v21 = vld [vmem:[#allocation3 + $0x5c] sm:$0x1]  ;;  %v3117_v23 = vsel %vm980_vm7, %v1023_v62, %v1027_v10  ;;  %v3119_v24 = vpack.c.b16 %v954_v11, %v954_v11  ;;  %v1058_v27 = vrot.slane %v1056_v13, 1  ;;  %v347_v30 = vld [vmem:[%s2943_s30 + $0x44] sm:$0xf]  ;;  %v729_v37 = vsel %vm2954_vm8, %v472_v15, %v728_v14 }
  0x50   : > { %1179 = vrot.lane.b32.xlu1 %v3117_v23, %s2832_s4  ;;  %v481_v36 = vsel %vm2965_vm9, %v473_v16, %v480_v17  ;;  %v733_v38 = vsel %vm2919_vm3, %v482_v20, %v732_v21  ;;  %308 = vst [vmem:[#allocation3 + $0x74] sm:$0x1] %v307_v28  ;;  %v501_v39 = vshrl.u32 %v346_v29, 16  ;;  %v262_v41 = vld [vmem:[#allocation3 + $0x84] sm:$0x1]  ;;  %v504_v45 = vshll.u32 %v346_v29, 16 }
  0x51   : > { %v1059_v42 = vor.u32 %v1058_v27, %v1054_v12  ;;  %v1061_v43 = vshll.u32 %v3119_v24, 16  ;;  %v3134_v44 = vld [vmem:[#allocation3 + $0x60] sm:$0xff]  ;;  %730 = vst [vmem:[#allocation3 + $0x54] sm:$0xf] %v729_v37  ;;  %v509_v47 = vshrl.u32 %v347_v30, 16  ;;  %v512_v50 = vshll.u32 %v347_v30, 16 }
  0x52   : > { %731 = vst.msk [vmem:[#allocation3 + $0x58] sm:$0xf] %vm219_vm0, %v481_v36  ;;  %v503_v49 = vrot.slane %v501_v39, 7  ;;  %v1078_v54 = vshrl.u32 %v3134_v44, 16  ;;  %v1080_v55 = vshll.u32 %v3134_v44, 16  ;;  %v263_v61 = vsel %vm2919_vm3, 0, %v262_v41 }
  0x53   : > { %v824_v48 = vld [vmem:[#allocation3 + $0x68] sm:$0x1]  ;;  %v1063_v51 = vrot.slane %v1061_v43, 1  ;;  %734 = vst [vmem:[#allocation3 + $0x5c] sm:$0x1] %v733_v38  ;;  %v511_v59 = vrot.slane %v509_v47, 7 }
  0x54   : > { %v956_v52 = vunpack.c.l.b16 %v824_v48  ;;  %v506_v57 = vor.u32 %v504_v45, %v503_v49  ;;  %v507_v58 = vrot.slane %v503_v49, 4  ;;  %v742_v60 = vld [vmem:[#allocation3 + $0x6c] sm:$0xf]  ;;  %v1082_v5 = vrot.slane %v1080_v55, 1  ;;  %264 = vst [vmem:[#allocation3 + $0x84] sm:$0x1] %v263_v61 }
  0x55   : > { %v3142_v62 = vsel %vm980_vm7, %v1059_v42, %v1063_v51  ;;  %v312_v8 = vld [vmem:[#allocation3 + $0x8c] sm:$0x1]  ;;  %v514_v9 = vor.u32 %v512_v50, %v511_v59  ;;  %v516_v10 = vrot.slane %v511_v59, 4  ;;  %v350_v13 = vld [vmem:[%s2943_s30 + $0x50] sm:$0xf]  ;;  %vm1557_vm11 = vcmask 64512  }
  0x56   : > { %v3144_v63 = vpack.c.b16 %v956_v52, %v956_v52  ;;  %1185 = vrot.lane.b32.xlu0 %v3142_v62, %s2832_s4  ;;  %v743_v11 = vsel %vm2954_vm8, %v506_v57, %v742_v60  ;;  %v313_v12 = vsel %vm2926_vm5, 0, %v312_v8  ;;  %v351_v14 = vld [vmem:[%s2943_s30 + $0x54] sm:$0xf]  ;;  %v1083_v15 = vor.u32 %v1082_v5, %v1078_v54  ;;  %v259_v29 = vld [vmem:[#allocation3 + $0x78] sm:$0x1] }
  0x57   : > { %744 = vst [vmem:[#allocation3 + $0x6c] sm:$0xf] %v743_v11  ;;  %v746_v17 = vld [vmem:[#allocation3 + $0x74] sm:$0x1]  ;;  %v535_v20 = vshrl.u32 %v350_v13, 16  ;;  %v515_v21 = vsel %vm2965_vm9, %v507_v58, %v514_v9  ;;  %v538_v27 = vshll.u32 %v350_v13, 16 }
  0x58   : > { %v1085_v16 = vshll.u32 %v3144_v63, 16  ;;  %v747_v22 = vsel %vm2919_vm3, %v516_v10, %v746_v17  ;;  %314 = vst [vmem:[#allocation3 + $0x8c] sm:$0x1] %v313_v12  ;;  %v543_v28 = vshrl.u32 %v351_v14, 16  ;;  %v546_v38 = vshll.u32 %v351_v14, 16 }
  0x59   : > { %v3159_v36 = vld [vmem:[#allocation3 + $0x54] sm:$0xff]  ;;  %745 = vst.msk [vmem:[#allocation3 + $0x70] sm:$0xf] %vm219_vm0, %v515_v21  ;;  %v537_v37 = vrot.slane %v535_v20, 7  ;;  %v260_v42 = vsel %vm2919_vm3, 0, %v259_v29  ;;  %vm1524_vm12 = vcmask 31744  }
  0x5a   : > { %v1087_v30 = vrot.slane %v1085_v16, 1  ;;  %v821_v39 = vld [vmem:[#allocation3 + $0x5c] sm:$0x1]  ;;  %748 = vst [vmem:[#allocation3 + $0x74] sm:$0x1] %v747_v22  ;;  %v545_v41 = vrot.slane %v543_v28, 7 }
  0x5b   : > { %v955_v45 = vunpack.c.l.b16 %v821_v39  ;;  %v1066_v47 = vshrl.u32 %v3159_v36, 16  ;;  %v1068_v48 = vshll.u32 %v3159_v36, 16  ;;  %261 = vst [vmem:[#allocation3 + $0x78] sm:$0x1] %v260_v42  ;;  %v309_v49 = vld [vmem:[#allocation3 + $0x80] sm:$0x1]  ;;  %v540_v50 = vor.u32 %v538_v27, %v537_v37 }
  0x5c   : > { %v3165_v43 = vsel %vm980_vm7, %v1083_v15, %v1087_v30  ;;  %v541_v51 = vrot.slane %v537_v37, 4  ;;  %v548_v52 = vor.u32 %v546_v38, %v545_v41  ;;  %v550_v54 = vrot.slane %v545_v41, 4  ;;  %v756_v55 = vld [vmem:[#allocation3 + $0x84] sm:$0xf]  ;;  %v348_v57 = vld [vmem:[%s2943_s30 + $0x48] sm:$0xf] }
  0x5d   : > { %1189 = vrot.lane.b32.xlu2 %v3165_v43, %s2832_s4  ;;  %v3172_v58 = vpack.c.b16 %v955_v45, %v955_v45  ;;  %v1070_v59 = vrot.slane %v1068_v48, 1  ;;  %v310_v60 = vsel %vm2926_vm5, 0, %v309_v49  ;;  %v349_v61 = vld [vmem:[%s2943_s30 + $0x4c] sm:$0xf]  ;;  %v518_v5 = vshrl.u32 %v348_v57, 16 }
  0x5e   : > { %v549_v8 = vsel %vm2965_vm9, %v541_v51, %v548_v52  ;;  %v757_v9 = vsel %vm2954_vm8, %v540_v50, %v756_v55  ;;  %311 = vst [vmem:[#allocation3 + $0x80] sm:$0x1] %v310_v60  ;;  %v521_v10 = vshll.u32 %v348_v57, 16  ;;  %v526_v11 = vshrl.u32 %v349_v61, 16  ;;  %v265_v12 = vld [vmem:[#allocation3 + $0x90] sm:$0x1] }
  0x5f   : > { %v1071_v13 = vor.u32 %v1070_v59, %v1066_v47  ;;  %v1073_v14 = vshll.u32 %v3172_v58, 16  ;;  %758 = vst [vmem:[#allocation3 + $0x84] sm:$0xf] %v757_v9  ;;  %v760_v15 = vld [vmem:[#allocation3 + $0x8c] sm:$0x1]  ;;  %v520_v16 = vrot.slane %v518_v5, 7 }
  0x60   : > { %v3182_v17 = vld [vmem:[#allocation3 + $0x6c] sm:$0xff]  ;;  %759 = vst.msk [vmem:[#allocation3 + $0x88] sm:$0xf] %vm219_vm0, %v549_v8  ;;  %v761_v20 = vsel %vm2919_vm3, %v550_v54, %v760_v15  ;;  %v528_v21 = vrot.slane %v526_v11, 7  ;;  %v529_v22 = vshll.u32 %v349_v61, 16  ;;  %v266_v27 = vsel %vm2919_vm3, 0, %v265_v12 }
  0x61   : > { %v1075_v28 = vrot.slane %v1073_v14, 1  ;;  %v827_v29 = vld [vmem:[#allocation3 + $0x74] sm:$0x1]  ;;  %762 = vst [vmem:[#allocation3 + $0x8c] sm:$0x1] %v761_v20  ;;  %v523_v30 = vor.u32 %v521_v10, %v520_v16  ;;  %v524_v37 = vrot.slane %v520_v16, 4 }
  0x62   : > { %v957_v38 = vunpack.c.l.b16 %v827_v29  ;;  %v1090_v39 = vshrl.u32 %v3182_v17, 16  ;;  %v1092_v41 = vshll.u32 %v3182_v17, 16  ;;  %v531_v42 = vor.u32 %v529_v22, %v528_v21  ;;  %v749_v45 = vld [vmem:[#allocation3 + $0x78] sm:$0xf]  ;;  %267 = vst [vmem:[#allocation3 + $0x90] sm:$0x1] %v266_v27 }
  0x63   : > { %v3192_v47 = vsel %vm980_vm7, %v1071_v13, %v1075_v28  ;;  %v533_v48 = vrot.slane %v528_v21, 4  ;;  %v750_v49 = vsel %vm2954_vm8, %v523_v30, %v749_v45  ;;  %v315_v50 = vld [vmem:[#allocation3 + $0x98] sm:$0x1]  ;;  %v353_v59 = vld [vmem:[%s2943_s30 + $0x5c] sm:$0xf]  ;;  %vm1590_vm13 = vcmask 97280  }
  0x64   : > { %v352_v51 = vld [vmem:[%s2943_s30 + $0x58] sm:$0xf]  ;;  %1187 = vrot.lane.b32.xlu1 %v3192_v47, %s2832_s4  ;;  %v3199_v52 = vpack.c.b16 %v957_v38, %v957_v38  ;;  %v1094_v54 = vrot.slane %v1092_v41, 1  ;;  %v532_v55 = vsel %vm2965_vm9, %v524_v37, %v531_v42  ;;  %751 = vst [vmem:[#allocation3 + $0x78] sm:$0xf] %v750_v49  ;;  %v316_v57 = vsel %vm2926_vm5, 0, %v315_v50 }
  0x65   : > { %752 = vst.msk [vmem:[#allocation3 + $0x7c] sm:$0xf] %vm219_vm0, %v532_v55  ;;  %v753_v60 = vld [vmem:[#allocation3 + $0x80] sm:$0x1]  ;;  %v552_v61 = vshrl.u32 %v352_v51, 16  ;;  %v555_v5 = vshll.u32 %v352_v51, 16 }
  0x66   : > { %v1095_v8 = vor.u32 %v1094_v54, %v1090_v39  ;;  %v1097_v9 = vshll.u32 %v3199_v52, 16  ;;  %v754_v10 = vsel %vm2919_vm3, %v533_v48, %v753_v60  ;;  %317 = vst [vmem:[#allocation3 + $0x98] sm:$0x1] %v316_v57  ;;  %v560_v11 = vshrl.u32 %v353_v59, 16  ;;  %v271_v12 = vld [vmem:[#allocation3 + $0xa8] sm:$0x1] }
  0x67   : > { %v3210_v13 = vld [vmem:[#allocation3 + $0x84] sm:$0xff]  ;;  %755 = vst [vmem:[#allocation3 + $0x80] sm:$0x1] %v754_v10  ;;  %v554_v14 = vrot.slane %v552_v61, 7  ;;  %v563_v15 = vshll.u32 %v353_v59, 16  ;;  %v272_v16 = vsel %vm2919_vm3, 0, %v271_v12 }
  0x68   : > { %v1099_v20 = vrot.slane %v1097_v9, 1  ;;  %v833_v21 = vld [vmem:[#allocation3 + $0x8c] sm:$0x1]  ;;  %v562_v22 = vrot.slane %v560_v11, 7  ;;  %273 = vst [vmem:[#allocation3 + $0xa8] sm:$0x1] %v272_v16 }
  0x69   : > { %v959_v27 = vunpack.c.l.b16 %v833_v21  ;;  %v1114_v28 = vshrl.u32 %v3210_v13, 16  ;;  %v1116_v29 = vshll.u32 %v3210_v13, 16  ;;  %v557_v30 = vor.u32 %v555_v5, %v554_v14  ;;  %v763_v37 = vld [vmem:[#allocation3 + $0x90] sm:$0xf]  ;;  %v356_v48 = vld [vmem:[%s2943_s30 + $0x68] sm:$0xf] }
  0x6a   : > { %v321_v38 = vld [vmem:[#allocation3 + $0xb0] sm:$0x1]  ;;  %v3217_v39 = vsel %vm980_vm7, %v1095_v8, %v1099_v20  ;;  %v558_v41 = vrot.slane %v554_v14, 4  ;;  %v565_v42 = vor.u32 %v563_v15, %v562_v22  ;;  %v567_v45 = vrot.slane %v562_v22, 4  ;;  %v357_v49 = vld [vmem:[%s2943_s30 + $0x6c] sm:$0xf] }
  0x6b   : > { %4116 = vst [vmem:[#allocation8_spill] sm:$0xff] %v3217_v39  ;;  %1191 = vrot.lane.b32.xlu0 %v3217_v39, %s2832_s4  ;;  %v3223_v50 = vpack.c.b16 %v959_v27, %v959_v27  ;;  %v1118_v51 = vrot.slane %v1116_v29, 1  ;;  %v764_v54 = vsel %vm2954_vm8, %v557_v30, %v763_v37  ;;  %v322_v55 = vsel %vm2926_vm5, 0, %v321_v38  ;;  %v268_v57 = vld [vmem:[#allocation3 + $0x9c] sm:$0x1] }
  0x6c   : > { %v318_v59 = vld [vmem:[#allocation3 + $0xa4] sm:$0x1]  ;;  %v3229_v60 = vld [vmem:[#allocation3 + $0x78] sm:$0xff]  ;;  %v566_v61 = vsel %vm2965_vm9, %v558_v41, %v565_v42  ;;  %765 = vst [vmem:[#allocation3 + $0x90] sm:$0xf] %v764_v54  ;;  %v586_v5 = vshrl.u32 %v356_v48, 16 }
  0x6d   : > { %v589_v8 = vshll.u32 %v356_v48, 16  ;;  %v594_v9 = vshrl.u32 %v357_v49, 16  ;;  %v1119_v10 = vor.u32 %v1118_v51, %v1114_v28  ;;  %v1121_v11 = vshll.u32 %v3223_v50, 16  ;;  %766 = vst.msk [vmem:[#allocation3 + $0x94] sm:$0xf] %vm219_vm0, %v566_v61 }
  0x6e   : > { %v767_v12 = vld [vmem:[#allocation3 + $0x98] sm:$0x1]  ;;  %v597_v14 = vshll.u32 %v357_v49, 16  ;;  %v830_v15 = vld [vmem:[#allocation3 + $0x80] sm:$0x1]  ;;  %v1102_v16 = vshrl.u32 %v3229_v60, 16 }
  0x6f   : > { %v1104_v20 = vshll.u32 %v3229_v60, 16  ;;  %v768_v21 = vsel %vm2919_vm3, %v567_v45, %v767_v12  ;;  %323 = vst [vmem:[#allocation3 + $0xb0] sm:$0x1] %v322_v55  ;;  %v1123_v22 = vrot.slane %v1121_v11, 1  ;;  %v958_v27 = vunpack.c.l.b16 %v830_v15  ;;  %v777_v37 = vld [vmem:[#allocation3 + $0xa8] sm:$0xf] }
  0x70   : > { %769 = vst [vmem:[#allocation3 + $0x98] sm:$0x1] %v768_v21  ;;  %v588_v28 = vrot.slane %v586_v5, 7  ;;  %v596_v29 = vrot.slane %v594_v9, 7  ;;  %v269_v38 = vsel %vm2919_vm3, 0, %v268_v57  ;;  %v319_v41 = vsel %vm2926_vm5, 0, %v318_v59 }
  0x71   : > { %v1106_v30 = vrot.slane %v1104_v20, 1  ;;  %v3244_v42 = vsel %vm980_vm7, %v1119_v10, %v1123_v22  ;;  %v3246_v45 = vpack.c.b16 %v958_v27, %v958_v27  ;;  %270 = vst [vmem:[#allocation3 + $0x9c] sm:$0x1] %v269_v38  ;;  %v354_v51 = vld [vmem:[%s2943_s30 + $0x60] sm:$0xf]  ;;  %vm2118_vm14 = vcmask 1041408  }
  0x72   : > { %v591_v48 = vor.u32 %v589_v8, %v588_v28  ;;  %v592_v49 = vrot.slane %v588_v28, 4  ;;  %1195 = vrot.lane.b32.xlu2 %v3244_v42, %s2832_s4  ;;  %v599_v55 = vor.u32 %v597_v14, %v596_v29  ;;  %v601_v61 = vrot.slane %v596_v29, 4  ;;  %320 = vst [vmem:[#allocation3 + $0xa4] sm:$0x1] %v319_v41  ;;  %v355_v57 = vld [vmem:[%s2943_s30 + $0x64] sm:$0xf] }
  0x73   : > { %v1107_v54 = vor.u32 %v1106_v30, %v1102_v16  ;;  %v569_v5 = vshrl.u32 %v354_v51, 16  ;;  %v1109_v59 = vshll.u32 %v3246_v45, 16  ;;  %v572_v10 = vshll.u32 %v354_v51, 16  ;;  %v274_v8 = vld [vmem:[#allocation3 + $0xb4] sm:$0x1] }
  0x74   : > { %v778_v9 = vsel %vm2954_vm8, %v591_v48, %v777_v37  ;;  %v577_v11 = vshrl.u32 %v355_v57, 16  ;;  %v3255_v12 = vld [vmem:[#allocation3 + $0x90] sm:$0xff]  ;;  %v600_v15 = vsel %vm2965_vm9, %v592_v49, %v599_v55  ;;  %v580_v14 = vshll.u32 %v355_v57, 16  ;;  %v324_v55 = vld [vmem:[#allocation3 + $0xbc] sm:$0x1] }
  0x75   : > { %779 = vst [vmem:[#allocation3 + $0xa8] sm:$0xf] %v778_v9  ;;  %v571_v16 = vrot.slane %v569_v5, 7  ;;  %v275_v20 = vsel %vm2919_vm3, 0, %v274_v8  ;;  %v1111_v21 = vrot.slane %v1109_v59, 1  ;;  %v1126_v29 = vshrl.u32 %v3255_v12, 16 }
  0x76   : > { %780 = vst.msk [vmem:[#allocation3 + $0xac] sm:$0xf] %vm219_vm0, %v600_v15  ;;  %v781_v22 = vld [vmem:[#allocation3 + $0xb0] sm:$0x1]  ;;  %v579_v27 = vrot.slane %v577_v11, 7  ;;  %v1128_v30 = vshll.u32 %v3255_v12, 16 }
  0x77   : > { %v836_v28 = vld [vmem:[#allocation3 + $0x98] sm:$0x1]  ;;  %v782_v37 = vsel %vm2919_vm3, %v601_v61, %v781_v22  ;;  %v574_v38 = vor.u32 %v572_v10, %v571_v16  ;;  %276 = vst [vmem:[#allocation3 + $0xb4] sm:$0x1] %v275_v20  ;;  %v3267_v41 = vsel %vm980_vm7, %v1107_v54, %v1111_v21  ;;  %v575_v49 = vrot.slane %v571_v16, 4 }
  0x78   : > { %v960_v48 = vunpack.c.l.b16 %v836_v28  ;;  %783 = vst [vmem:[#allocation3 + $0xb0] sm:$0x1] %v782_v37  ;;  %v582_v51 = vor.u32 %v580_v14, %v579_v27  ;;  %1193 = vrot.lane.b32.xlu1 %v3267_v41, %s2832_s4  ;;  %v1130_v57 = vrot.slane %v1128_v30, 1  ;;  %v584_v5 = vrot.slane %v579_v27, 4  ;;  %v770_v59 = vld [vmem:[#allocation3 + $0x9c] sm:$0xf] }
  0x79   : > { %v325_v61 = vsel %vm2926_vm5, 0, %v324_v55  ;;  %v771_v10 = vsel %vm2954_vm8, %v574_v38, %v770_v59  ;;  %v774_v11 = vld [vmem:[#allocation3 + $0xa4] sm:$0x1]  ;;  %v358_v8 = vld [vmem:[%s2943_s30 + $0x70] sm:$0xf]  ;;  %vm1623_vm15 = vcmask 130048  }
  0x7a   : > { %v3273_v9 = vpack.c.b16 %v960_v48, %v960_v48  ;;  %v583_v54 = vsel %vm2965_vm9, %v575_v49, %v582_v51  ;;  %326 = vst [vmem:[#allocation3 + $0xbc] sm:$0x1] %v325_v61  ;;  %v775_v15 = vsel %vm2919_vm3, %v584_v5, %v774_v11  ;;  %v359_v16 = vld [vmem:[%s2943_s30 + $0x74] sm:$0xf]  ;;  %v603_v14 = vshrl.u32 %v358_v8, 16 }
  0x7b   : > { %772 = vst [vmem:[#allocation3 + $0x9c] sm:$0xf] %v771_v10  ;;  %v606_v20 = vshll.u32 %v358_v8, 16  ;;  %v1131_v21 = vor.u32 %v1130_v57, %v1126_v29  ;;  %v611_v27 = vshrl.u32 %v359_v16, 16  ;;  %v614_v28 = vshll.u32 %v359_v16, 16 }
  0x7c   : > { %v1133_v22 = vshll.u32 %v3273_v9, 16  ;;  %773 = vst.msk [vmem:[#allocation3 + $0xa0] sm:$0xf] %vm219_vm0, %v583_v54  ;;  %v605_v37 = vrot.slane %v603_v14, 7  ;;  %vm1689_vm1 = vcmask 195584   ;;  %vm1722_vm2 = vcmask 228352  }
  0x7d   : > { %v3285_v30 = vld [vmem:[#allocation3 + $0xa8] sm:$0xff]  ;;  %776 = vst [vmem:[#allocation3 + $0xa4] sm:$0x1] %v775_v15  ;;  %v613_v48 = vrot.slane %v611_v27, 7  ;;  %vm1900_vm4 = vcmask 289792  }
  0x7e   : > { %v1135_v38 = vrot.slane %v1133_v22, 1  ;;  %v784_v49 = vld [vmem:[#allocation3 + $0xb4] sm:$0xf]  ;;  %v1150_v55 = vshrl.u32 %v3285_v30, 16  ;;  %v1152_v5 = vshll.u32 %v3285_v30, 16  ;;  %v608_v59 = vor.u32 %v606_v20, %v605_v37 }
  0x7f   : > { %v842_v51 = vld [vmem:[#allocation3 + $0xb0] sm:$0x1]  ;;  %v609_v29 = vrot.slane %v605_v37, 4  ;;  %v616_v54 = vor.u32 %v614_v28, %v613_v48  ;;  %v618_v10 = vrot.slane %v613_v48, 4 }
  0x80   : > { %v3290_v57 = vsel %vm980_vm7, %v1131_v21, %v1135_v38  ;;  %v962_v61 = vunpack.c.l.b16 %v842_v51  ;;  %v1154_v11 = vrot.slane %v1152_v5, 1  ;;  %v785_v8 = vsel %vm2954_vm8, %v608_v59, %v784_v49 }
  0x81   : > { %1197 = vrot.lane.b32.xlu0 %v3290_v57, %s2832_s4  ;;  %v788_v15 = vld [vmem:[#allocation3 + $0xbc] sm:$0x1]  ;;  %v617_v14 = vsel %vm2965_vm9, %v609_v29, %v616_v54  ;;  %786 = vst [vmem:[#allocation3 + $0xb4] sm:$0xf] %v785_v8  ;;  %v1209_v54 = vrot.slane %v3032_v7, 1 }
  0x82   : > { %v3296_v16 = vpack.c.b16 %v962_v61, %v962_v61  ;;  %v789_v20 = vsel %vm2919_vm3, %v618_v10, %v788_v15  ;;  %787 = vst.msk [vmem:[#allocation3 + $0xb8] sm:$0xf] %vm219_vm0, %v617_v14  ;;  %v1155_v22 = vor.u32 %v1154_v11, %v1150_v55  ;;  %v1210_v10 = vrot.slane %v3047_v34, 1  ;;  %v3332_v34 = vld [vmem:[#allocation3] sm:$0xff] }
  0x83   : > { %v3302_v21 = vld [vmem:[#allocation3 + $0x9c] sm:$0xff]  ;;  %790 = vst [vmem:[#allocation3 + $0xbc] sm:$0x1] %v789_v20 }
  0x84   : > { %v1157_v27 = vshll.u32 %v3296_v16, 16  ;;  %v839_v28 = vld [vmem:[#allocation3 + $0xa4] sm:$0x1]  ;;  %v1138_v38 = vshrl.u32 %v3302_v21, 16  ;;  %v1140_v48 = vshll.u32 %v3302_v21, 16 }
  0x85   : > { %v961_v37 = vunpack.c.l.b16 %v839_v28 }
  0x86   : > { %v1159_v49 = vrot.slane %v1157_v27, 1  ;;  %v1142_v5 = vrot.slane %v1140_v48, 1  ;;  %v1207_v48 = vrot.slane %v2961_v31, 1  ;;  %v1212_v31 = vrot.slane %v3012_v46, 1 }
  0x87   : > { %v3308_v51 = vpack.c.b16 %v961_v37, %v961_v37  ;;  %v3330_v37 = vsel %vm1205_vm10, %v1209_v54, %v1210_v10 }
  0x88   : > { %v3311_v59 = vsel %vm980_vm7, %v1155_v22, %v1159_v49  ;;  %v1143_v55 = vor.u32 %v1142_v5, %v1138_v38  ;;  %v1206_v38 = vrot.slane %v3332_v34, 1 }
  0x89   : > { %1201 = vrot.lane.b32.xlu2 %v3311_v59, %s2832_s4  ;;  %v1145_v29 = vshll.u32 %v3308_v51, 16  ;;  %v3316_v61 = vld [vmem:[#allocation3 + $0xb4] sm:$0xff] }
  0x8a   : > { %v845_v8 = vld [vmem:[#allocation3 + $0xbc] sm:$0x1]  ;;  %v1162_v14 = vshrl.u32 %v3316_v61, 16  ;;  %v1164_v20 = vshll.u32 %v3316_v61, 16  ;;  %v1208_v54 = vsel %vm1205_vm10, %v1206_v38, %v1207_v48  ;;  %v1224_v48 = vrot.slane %v3112_v4, 1 }
  0x8b   : > { %v1147_v11 = vrot.slane %v1145_v29, 1  ;;  %v963_v15 = vunpack.c.l.b16 %v845_v8  ;;  %v1218_v29 = vrot.slane %v2996_v19, 1  ;;  %v1213_v8 = vrot.slane %v3027_v0, 1 }
  0x8c   : > { %v1166_v28 = vrot.slane %v1164_v20, 1  ;;  %v1215_v19 = vrot.slane %v3080_v18, 1  ;;  %v1227_v20 = vrot.slane %v3159_v36, 1  ;;  %v1221_v0 = vrot.slane %v3049_v35, 1 }
  0x8d   : > { %v3323_v22 = vsel %vm980_vm7, %v1143_v55, %v1147_v11  ;;  %v3327_v27 = vpack.c.b16 %v963_v15, %v963_v15  ;;  %v1219_v11 = vrot.slane %v3005_v40, 1  ;;  %v1216_v40 = vrot.slane %v3104_v53, 1 }
  0x8e   : > { %4117 = vst [vmem:[#allocation9_spill] sm:$0xff] %v3323_v22  ;;  %1199 = vrot.lane.b32.xlu1 %v3323_v22, %s2832_s4  ;;  %v1167_v49 = vor.u32 %v1166_v28, %v1162_v14  ;;  %v3358_v14 = vsel %vm1205_vm10, %v1212_v31, %v1213_v8  ;;  %v1228_v28 = vrot.slane %v3172_v58, 1  ;;  %v1222_v53 = vrot.slane %v3062_v56, 1 }
  0x8f   : > { %v1169_v5 = vshll.u32 %v3327_v27, 16  ;;  %v3351_v15 = vsel %vm1205_vm10, %v1218_v29, %v1219_v11  ;;  %v3363_v46 = vsel %vm1205_vm10, %v1215_v19, %v1216_v40  ;;  %v1225_v58 = vrot.slane %v3119_v24, 1 }
  0x90   : > { %v3372_v38 = vsel %vm1205_vm10, %v1227_v20, %v1228_v28  ;;  %v1230_v56 = vrot.slane %v3134_v44, 1  ;;  %v1231_v24 = vrot.slane %v3144_v63, 1  ;;  %v1245_v8 = vrot.slane %v3302_v21, 1 }
  0x91   : > { %1256 = vrot.lane.b32.xlu2 %v3330_v37, %s2833_s5  ;;  %v1171_v55 = vrot.slane %v1169_v5, 1  ;;  %v1236_v5 = vrot.slane %v3229_v60, 1  ;;  %v3384_v29 = vsel %vm1205_vm10, %v1224_v48, %v1225_v58  ;;  %v1246_v19 = vrot.slane %v3308_v51, 1 }
  0x92   : > { %v3400_v31 = vsel %vm1205_vm10, %v1230_v56, %v1231_v24  ;;  %v1239_v63 = vrot.slane %v3210_v13, 1  ;;  %v1242_v28 = vrot.slane %v3255_v12, 1  ;;  %v1243_v51 = vrot.slane %v3273_v9, 1  ;;  %v1182_v56 = vpop.permute.xlu2 %1181 }
  0x93   : > { %v3343_v10 = vsel %vm980_vm7, %v1167_v49, %v1171_v55  ;;  %v3379_v49 = vsel %vm1205_vm10, %v1221_v0, %v1222_v53  ;;  %v1237_v55 = vrot.slane %v3246_v45, 1  ;;  %v1234_v45 = vrot.slane %v3199_v52, 1 }
  0x94   : > { %1203 = vrot.lane.b32.xlu0 %v3343_v10, %s2832_s4  ;;  %v1240_v52 = vrot.slane %v3223_v50, 1  ;;  %v3414_v20 = vsel %vm1205_vm10, %v1245_v8, %v1246_v19  ;;  %v3424_v53 = vsel %vm1205_vm10, %v1242_v28, %v1243_v51  ;;  %v1248_v50 = vrot.slane %v3285_v30, 1  ;;  %v2746_v28 = vld [vmem:[#allocation3 + $0xc] sm:$0xff]  ;;  %s2462_s4 = sshll.u32 %s199_s28, 8 }
  0x95   : > { %v3393_v11 = vsel %vm1205_vm10, %v1236_v5, %v1237_v55  ;;  %4119 = vst [vmem:[#allocation11_spill] sm:$0xff] %v3414_v20  ;;  %v1249_v48 = vrot.slane %v3296_v16, 1  ;;  %v1251_v9 = vrot.slane %v3316_v61, 1  ;;  %v1252_v58 = vrot.slane %v3327_v27, 1  ;;  %v3446_v16 = vld [vmem:[#allocation3 + $0x30] sm:$0xff]  ;;  %v3450_v27 = vld [vmem:[#allocation3 + $0x18] sm:$0xff] }
  0x96   : > { %1254 = vrot.lane.b32.xlu1 %v1208_v54, %s2833_s5  ;;  %v1233_v54 = vrot.slane %v3182_v17, 1  ;;  %v3421_v0 = vsel %vm1205_vm10, %v1239_v63, %v1240_v52 }
  0x97   : > { %v3437_v5 = vsel %vm1205_vm10, %v1248_v50, %v1249_v48  ;;  %v3440_v55 = vsel %vm1205_vm10, %v1251_v9, %v1252_v58  ;;  %v1534_v58 = vsel %vm1524_vm12, %v3446_v16, %v1182_v56 }
  0x98   : > { %v3405_v40 = vsel %vm1205_vm10, %v1233_v54, %v1234_v45 }
  0x99   : > { %1262 = vrot.lane.b32.xlu2 %v3351_v15, %s2833_s5  ;;  %4118 = vst [vmem:[#allocation10_spill] sm:$0xff] %v3405_v40 }
  0x9a   : > { %v1174_v54 = vpop.permute.xlu0 %1173 }
  0x9c   : > { %1258 = vrot.lane.b32.xlu0 %v3358_v14, %s2833_s5 }
  0x9e   : > { %1260 = vrot.lane.b32.xlu1 %v3363_v46, %s2833_s5 }
  0xa1   : > { %1268 = vrot.lane.b32.xlu2 %v3372_v38, %s2833_s5 }
  0xa4   : > { %1264 = vrot.lane.b32.xlu0 %v3379_v49, %s2833_s5 }
  0xa6   : > { %1266 = vrot.lane.b32.xlu1 %v3384_v29, %s2833_s5 }
  0xa9   : > { %1274 = vrot.lane.b32.xlu2 %v3393_v11, %s2833_s5 }
  0xac   : > { %1270 = vrot.lane.b32.xlu0 %v3400_v31, %s2833_s5 }
  0xae   : > { %1272 = vrot.lane.b32.xlu1 %v3405_v40, %s2833_s5  ;;  %v1178_v45 = vpop.permute.xlu1 %1177 }
  0xb1   : > { %1280 = vrot.lane.b32.xlu2 %v3414_v20, %s2833_s5 }
  0xb4   : > { %1276 = vrot.lane.b32.xlu0 %v3421_v0, %s2833_s5  ;;  %v1176_v8 = vpop.permute.xlu0 %1175 }
  0xb5   : > { %v1528_v51 = vsel %vm1524_vm12, %v2746_v28, %v1176_v8 }
  0xb6   : > { %1278 = vrot.lane.b32.xlu1 %v3424_v53, %s2833_s5 }
  0xb9   : > { %1291 = vrot.lane.b32.xlu2 %v3032_v7, %s2834_s6  ;;  %v3454_v7 = vpop.permute.xlu2 %1183 }
  0xbc   : > { %1282 = vrot.lane.b32.xlu0 %v3437_v5, %s2833_s5 }
  0xbe   : > { %1284 = vrot.lane.b32.xlu1 %v3440_v55, %s2833_s5 }
  0xc1   : > { %1297 = vrot.lane.b32.xlu2 %v3446_v16, %s2834_s6  ;;  %v3464_v24 = vpop.permute.xlu2 %1189 }
  0xc2   : > { %v1180_v19 = vpop.permute.xlu1 %1179 }
  0xc4   : > { %1293 = vrot.lane.b32.xlu0 %v3450_v27, %s2834_s6 }
  0xc6   : > { %1295 = vrot.lane.b32.xlu1 %v3080_v18, %s2834_s6 }
  0xc8   : > { %v1186_v52 = vpop.permute.xlu0 %1185 }
  0xc9   : > { %1303 = vrot.lane.b32.xlu2 %v3159_v36, %s2834_s6 }
  0xcc   : > { %1299 = vrot.lane.b32.xlu0 %v3049_v35, %s2834_s6  ;;  %v3474_v35 = vpop.permute.xlu2 %1195 }
  0xce   : > { %1301 = vrot.lane.b32.xlu1 %v3112_v4, %s2834_s6 }
  0xd1   : > { %1309 = vrot.lane.b32.xlu2 %v3229_v60, %s2834_s6 }
  0xd4   : > { %1305 = vrot.lane.b32.xlu0 %v3134_v44, %s2834_s6 }
  0xd6   : > { %1307 = vrot.lane.b32.xlu1 %v3182_v17, %s2834_s6  ;;  %v1188_v48 = vpop.permute.xlu1 %1187 }
  0xd9   : > { %1315 = vrot.lane.b32.xlu2 %v3302_v21, %s2834_s6 }
  0xdc   : > { %1311 = vrot.lane.b32.xlu0 %v3210_v13, %s2834_s6 }
  0xde   : > { %1313 = vrot.lane.b32.xlu1 %v3255_v12, %s2834_s6 }
  0xe1   : > { %1389 = vrot.lane.b32.xlu2 %v3405_v40, %s2835_s7  ;;  %v1192_v40 = vpop.permute.xlu0 %1191 }
  0xe3   : > { %v3482_v63 = vpop.permute.xlu2 %1201 }
  0xe4   : > { %1354 = vrot.lane.b32.xlu0 %v3217_v39, %s2836_s8 }
  0xe6   : > { %1362 = vrot.lane.b32.xlu1 %v3323_v22, %s2836_s8 }
  0xe9   : > { %1434 = vrot.lane.b32.xlu2 %v3285_v30, %s2837_s9 }
  0xeb   : > { %v1257_v50 = vpop.permute.xlu2 %1256 }
  0xec   : > { %v3492_v9 = vsel %vm1557_vm11, %v1528_v51, %v1257_v50  ;;  %1397 = vrot.lane.b32.xlu0 %v3414_v20, %s2835_s7  ;;  %v1194_v51 = vpop.permute.xlu1 %1193  ;;  %v1540_v50 = vsel %vm1524_vm12, %v3159_v36, %v1188_v48 }
  0xee   : > { %1426 = vrot.lane.b32.xlu1 %v3229_v60, %s2837_s9 }
  0xf1   : > { %1508 = vrot.lane.b32.xlu2 %v3393_v11, %s2838_s10 }
  0xf3   : > { %v1263_v8 = vpop.permute.xlu2 %1262 }
  0xf4   : > { %v3503_v28 = vsel %vm1557_vm11, %v1534_v58, %v1263_v8  ;;  %1473 = vrot.lane.b32.xlu0 %v3267_v41, %s2839_s11  ;;  %v1198_v58 = vpop.permute.xlu0 %1197 }
  0xf6   : > { %1481 = vrot.lane.b32.xlu1 %v3311_v59, %s2839_s11 }
  0xf9   : > { %1346 = vrot.lane.b32.xlu2 %v3087_v26, %s2836_s8  ;;  %v1546_v26 = vsel %vm1524_vm12, %v3229_v60, %v1194_v51 }
  0xfb   : > { %v1269_v56 = vpop.permute.xlu2 %1268 }
  0xfc   : > { %v3514_v39 = vsel %vm1557_vm11, %v1540_v50, %v1269_v56  ;;  %1516 = vrot.lane.b32.xlu0 %v3437_v5, %s2838_s10 }
  0xfe   : > { %1338 = vrot.lane.b32.xlu1 %v3070_v3, %s2836_s8  ;;  %v1526_v3 = vsel %vm1524_vm12, %v3332_v34, %v1174_v54  ;;  %v1532_v54 = vsel %vm1524_vm12, %v3080_v18, %v1180_v19  ;;  %v3562_v18 = vld [vmem:[#allocation3 + $0x3c] sm:$0xff]  ;;  %v1538_v19 = vsel %vm1524_vm12, %v3112_v4, %v1186_v52  ;;  %v1544_v52 = vsel %vm1524_vm12, %v3182_v17, %v1192_v40 }
  0xff   : > { %v1550_v40 = vsel %vm1524_vm12, %v3255_v12, %v1198_v58 }
 0x100   : > { %v1200_v8 = vpop.permute.xlu1 %1199 }
 0x101   : > { %1410 = vrot.lane.b32.xlu2 %v3450_v27, %s2837_s9 }
 0x103   : > { %v1275_v22 = vpop.permute.xlu2 %1274 }
 0x104   : > { %v3525_v48 = vsel %vm1557_vm11, %v1546_v26, %v1275_v22  ;;  %1373 = vrot.lane.b32.xlu0 %v3330_v37, %s2835_s7  ;;  %v1552_v26 = vsel %vm1524_vm12, %v3302_v21, %v1200_v8  ;;  %v1530_v37 = vsel %vm1524_vm12, %v3450_v27, %v1178_v45  ;;  %v1536_v27 = vsel %vm1524_vm12, %v3562_v18, %v3454_v7 }
 0x106   : > { %1381 = vrot.lane.b32.xlu1 %v3379_v49, %s2835_s7  ;;  %v1204_v50 = vpop.permute.xlu0 %1203 }
 0x107   : > { %v1556_v58 = vsel %vm1524_vm12, %v3316_v61, %v1204_v50  ;;  %v360_v50 = vld [vmem:[%s2943_s30 + $0x78] sm:$0xf] }
 0x108   : > { %v1255_v56 = vpop.permute.xlu1 %1254 }
 0x109   : > { %v1559_v20 = vsel %vm1557_vm11, %v1526_v3, %v1255_v56  ;;  %1465 = vrot.lane.b32.xlu2 %v3142_v62, %s2839_s11 }
 0x10b   : > { %v1281_v60 = vpop.permute.xlu2 %1280 }
 0x10c   : > { %v3539_v22 = vsel %vm1557_vm11, %v1552_v26, %v1281_v60  ;;  %1418 = vrot.lane.b32.xlu0 %v3112_v4, %s2837_s9  ;;  %v1542_v4 = vsel %vm1524_vm12, %v3134_v44, %v3464_v24  ;;  %v1548_v44 = vsel %vm1524_vm12, %v3210_v13, %v3474_v35 }
 0x10e   : > { %1457 = vrot.lane.b32.xlu1 %v3045_v32, %s2839_s11  ;;  %v1259_v34 = vpop.permute.xlu0 %1258 }
 0x10f   : > { %v3550_v51 = vsel %vm1557_vm11, %v1530_v37, %v1259_v34 }
 0x110   : > { %v1261_v8 = vpop.permute.xlu1 %1260 }
 0x111   : > { %v1565_v3 = vsel %vm1557_vm11, %v1532_v54, %v1261_v8  ;;  %1317 = vrot.lane.b32.xlu2 %v3285_v30, %s2834_s6 }
 0x113   : > { %v1292_v56 = vpop.permute.xlu2 %1291 }
 0x114   : > { %v3556_v26 = vsel %vm1590_vm13, %v1559_v20, %v1292_v56  ;;  %1492 = vrot.lane.b32.xlu0 %v3358_v14, %s2838_s10 }
 0x116   : > { %1500 = vrot.lane.b32.xlu1 %v3384_v29, %s2838_s10  ;;  %v1265_v45 = vpop.permute.xlu0 %1264 }
 0x117   : > { %v3570_v60 = vsel %vm1557_vm11, %v1536_v27, %v1265_v45 }
 0x118   : > { %v1267_v20 = vpop.permute.xlu1 %1266 }
 0x119   : > { %v1571_v37 = vsel %vm1557_vm11, %v1538_v19, %v1267_v20  ;;  %1391 = vrot.lane.b32.xlu2 %v3393_v11, %s2835_s7 }
 0x11b   : > { %v1298_v34 = vpop.permute.xlu2 %1297 }
 0x11c   : > { %v3576_v54 = vsel %vm1590_vm13, %v1565_v3, %v1298_v34  ;;  %1356 = vrot.lane.b32.xlu0 %v3267_v41, %s2836_s8  ;;  %v277_v34 = vld [vmem:[#allocation3 + $0xc0] sm:$0x1] }
 0x11e   : > { %1364 = vrot.lane.b32.xlu1 %v3311_v59, %s2836_s8  ;;  %v1271_v7 = vpop.permute.xlu0 %1270 }
 0x11f   : > { %v3588_v11 = vsel %vm1557_vm11, %v1542_v4, %v1271_v7  ;;  %v327_v4 = vld [vmem:[#allocation3 + $0xc8] sm:$0x1]  ;;  %v278_v7 = vsel %vm2919_vm3, 0, %v277_v34 }
 0x120   : > { %v1273_v8 = vpop.permute.xlu1 %1272  ;;  %279 = vst [vmem:[#allocation3 + $0xc0] sm:$0x1] %v278_v7 }
 0x121   : > { %v1577_v3 = vsel %vm1557_vm11, %v1544_v52, %v1273_v8  ;;  %1436 = vrot.lane.b32.xlu2 %v3316_v61, %s2837_s9  ;;  %v361_v52 = vld [vmem:[%s2943_s30 + $0x7c] sm:$0xf]  ;;  %v620_v8 = vshrl.u32 %v360_v50, 16 }
 0x122   : > { %v631_v2 = vshll.u32 %v361_v52, 16 }
 0x123   : > { %v1304_v41 = vpop.permute.xlu2 %1303 }
 0x124   : > { %v3594_v59 = vsel %vm1590_vm13, %v1571_v37, %v1304_v41  ;;  %1399 = vrot.lane.b32.xlu0 %v3437_v5, %s2835_s7  ;;  %v622_v41 = vrot.slane %v620_v8, 7 }
 0x126   : > { %1428 = vrot.lane.b32.xlu1 %v3210_v13, %s2837_s9  ;;  %v1277_v17 = vpop.permute.xlu0 %1276  ;;  %v1554_v13 = vsel %vm1524_vm12, %v3285_v30, %v3482_v63  ;;  %v328_v30 = vsel %vm2926_vm5, 0, %v327_v4  ;;  %vm2069_vm5 = vcmask 293888  }
 0x127   : > { %v3606_v24 = vsel %vm1557_vm11, %v1548_v44, %v1277_v17  ;;  %329 = vst [vmem:[#allocation3 + $0xc8] sm:$0x1] %v328_v30  ;;  %v623_v44 = vshll.u32 %v360_v50, 16 }
 0x128   : > { %v1279_v56 = vpop.permute.xlu1 %1278 }
 0x129   : > { %v3609_v27 = vsel %vm1557_vm11, %v1550_v40, %v1279_v56  ;;  %1510 = vrot.lane.b32.xlu2 %v3421_v0, %s2838_s10 }
 0x12b   : > { %v1310_v5 = vpop.permute.xlu2 %1309 }
 0x12c   : > { %v3614_v45 = vsel %vm1590_vm13, %v1577_v3, %v1310_v5  ;;  %1475 = vrot.lane.b32.xlu0 %v3244_v42, %s2839_s11  ;;  %v628_v3 = vshrl.u32 %v361_v52, 16 }
 0x12e   : > { %1483 = vrot.lane.b32.xlu1 %v3343_v10, %s2839_s11  ;;  %v1283_v35 = vpop.permute.xlu0 %1282  ;;  %v630_v17 = vrot.slane %v628_v3, 7  ;;  %v795_v30 = vld [vmem:[#allocation3 + $0xc8] sm:$0x1] }
 0x12f   : > { %v3626_v19 = vsel %vm1557_vm11, %v1554_v13, %v1283_v35  ;;  %v2748_v13 = vld [vmem:[#allocation3 + $0x24] sm:$0xff]  ;;  %v625_v35 = vor.u32 %v623_v44, %v622_v41 }
 0x130   : > { %v1285_v20 = vpop.permute.xlu1 %1284  ;;  %v635_v34 = vrot.slane %v630_v17, 4 }
 0x131   : > { %v3629_v37 = vsel %vm1557_vm11, %v1556_v58, %v1285_v20  ;;  %1348 = vrot.lane.b32.xlu2 %v3142_v62, %s2836_s8  ;;  %v626_v58 = vrot.slane %v622_v41, 4  ;;  %v791_v20 = vld [vmem:[#allocation3 + $0xc0] sm:$0xf] }
 0x133   : > { %v3637_v63 = vpop.permute.xlu2 %1315 }
 0x134   : > { %1518 = vrot.lane.b32.xlu0 %v3440_v55, %s2838_s10 }
 0x136   : > { %1340 = vrot.lane.b32.xlu1 %v3045_v32, %s2836_s8  ;;  %v1294_v62 = vpop.permute.xlu0 %1293  ;;  %v633_v32 = vor.u32 %v631_v2, %v630_v17 }
 0x137   : > { %v3647_v40 = vsel %vm1590_vm13, %v3492_v9, %v1294_v62  ;;  %v792_v9 = vsel %vm2954_vm8, %v625_v35, %v791_v20 }
 0x138   : > { %v1296_v56 = vpop.permute.xlu1 %1295  ;;  %v634_v7 = vsel %vm2965_vm9, %v626_v58, %v633_v32  ;;  %793 = vst [vmem:[#allocation3 + $0xc0] sm:$0xf] %v792_v9 }
 0x139   : > { %v3651_v5 = vsel %vm1590_vm13, %v3550_v51, %v1296_v56  ;;  %1412 = vrot.lane.b32.xlu2 %v2748_v13, %s2837_s9  ;;  %v796_v51 = vsel %vm2919_vm3, %v635_v34, %v795_v30  ;;  %794 = vst.msk [vmem:[#allocation3 + $0xc4] sm:$0xf] %vm219_vm0, %v634_v7  ;;  %vm1656_vm0 = vcmask 162816   ;;  %vm1755_vm3 = vcmask 261120  }
 0x13a   : > { %797 = vst [vmem:[#allocation3 + $0xc8] sm:$0x1] %v796_v51 }
 0x13b   : > { %v3654_v4 = vpop.permute.xlu2 %1389 }
 0x13c   : > { %1375 = vrot.lane.b32.xlu0 %v3358_v14, %s2835_s7 }
 0x13e   : > { %1383 = vrot.lane.b32.xlu1 %v3384_v29, %s2835_s7  ;;  %v1300_v50 = vpop.permute.xlu0 %1299  ;;  %v1969_v29 = vld [vmem:[%s4097_s1 + $0x10] sm:$0x3] }
 0x13f   : > { %v3669_v33 = vsel %vm1590_vm13, %v3503_v28, %v1300_v50  ;;  %v2063_v8 = vunpack.c.l.b16 %v1969_v29 }
 0x140   : > { %v1302_v25 = vpop.permute.xlu1 %1301  ;;  %v3713_v13 = vld [vmem:[#allocation3 + $0xc0] sm:$0xff] }
 0x141   : > { %v3673_v52 = vsel %vm1590_vm13, %v3570_v60, %v1302_v25  ;;  %1467 = vrot.lane.b32.xlu2 %v3192_v47, %s2839_s11  ;;  %v848_v17 = vld [vmem:[#allocation3 + $0xc8] sm:$0x1]  ;;  %v1329_v58 = vshll.u32 %v3713_v13, 16  ;;  %v1327_v34 = vshrl.u32 %v3713_v13, 16 }
 0x142   : > { %v1324_v35 = vunpack.c.l.b16 %v848_v17 }
 0x143   : > { %v3677_v1 = vpop.permute.xlu2 %1434 }
 0x144   : > { %1420 = vrot.lane.b32.xlu0 %v3159_v36, %s2837_s9  ;;  %v2066_v36 = vpack.c.b16 %v2063_v8, %v2063_v8  ;;  %v1370_v8 = vrot.slane %v3713_v13, 1 }
 0x146   : > { %1459 = vrot.lane.b32.xlu1 %v3117_v23, %s2839_s11  ;;  %v1306_v14 = vpop.permute.xlu0 %1305  ;;  %v2120_v62 = vsel %vm2118_vm14, %v2066_v36, 0 }
 0x147   : > { %v3688_v28 = vsel %vm1590_vm13, %v3514_v39, %v1306_v14  ;;  %2669 = vmatpush.bf16.msra.mxu2 %v2120_v62  ;;  %v2666_v39 = vld [vmem:[%s4097_s1 + $0x8] sm:$0xff]  ;;  %2670 = vmatpush.bf16.msra.mxu3 %v2120_v62 }
 0x148   : > { %v1308_v60 = vpop.permute.xlu1 %1307  ;;  %2127 = vmatpush.bf16.msra.mxu0 %v2120_v62  ;;  %2668 = vmatpush.bf16.msra.mxu1 %v2120_v62 }
 0x149   : > { %1319 = vrot.lane.b32.xlu2 %v3316_v61, %s2834_s6  ;;  %v1608_v51 = vsel %vm1590_vm13, %v3588_v11, %v1308_v60  ;;  %v1616_v11 = vsel %vm1590_vm13, %v3609_v27, %v3637_v63 }
 0x14b   : > { %v3692_v3 = vpop.permute.xlu2 %1508  ;;  %2672 = vmatpush.bf16.msra.mxu2 %v2666_v39  ;;  %2673 = vmatpush.bf16.msra.mxu3 %v2666_v39 }
 0x14c   : > { %1494 = vrot.lane.b32.xlu0 %v3363_v46, %s2838_s10  ;;  %2128 = vmatpush.bf16.msra.mxu0 %v2666_v39 }
 0x14d   : > { %2671 = vmatpush.bf16.msra.mxu1 %v2666_v39 }
 0x14e   : > { %1502 = vrot.lane.b32.xlu1 %v3372_v38, %s2838_s10  ;;  %v1312_v41 = vpop.permute.xlu0 %1311 }
 0x14f   : > { %v3703_v61 = vsel %vm1590_vm13, %v3525_v48, %v1312_v41  ;;  %v2665_v48 = vld [vmem:[%s4097_s1] sm:$0xff] }
 0x150   : > { %v1314_v44 = vpop.permute.xlu1 %1313  ;;  %2675 = vmatpush.bf16.msra.mxu2 %v2665_v48  ;;  %2676 = vmatpush.bf16.msra.mxu3 %v2665_v48 }
 0x151   : > { %v3707_v2 = vsel %vm1590_vm13, %v3606_v24, %v1314_v44  ;;  %1393 = vrot.lane.b32.xlu2 %v3421_v0, %s2835_s7  ;;  %v1325_v24 = vpack.c.b16 %v1324_v35, %v1324_v35  ;;  %2129 = vmatpush.bf16.msra.mxu0 %v2665_v48 }
 0x152   : > { %2674 = vmatpush.bf16.msra.mxu1 %v2665_v48 }
 0x153   : > { %v3711_v56 = vpop.permute.xlu2 %1346  ;;  %v1334_v7 = vshll.u32 %v1325_v24, 16  ;;  %v1371_v36 = vrot.slane %v1325_v24, 1 }
 0x154   : > { %1358 = vrot.lane.b32.xlu0 %v3244_v42, %s2836_s8  ;;  %v1331_v42 = vrot.slane %v1329_v58, 1 }
 0x155   : > { %v1336_v30 = vrot.slane %v1334_v7, 1  ;;  %v3761_v17 = vsel %vm1205_vm10, %v1370_v8, %v1371_v36 }
 0x156   : > { %1366 = vrot.lane.b32.xlu1 %v3343_v10, %s2836_s8  ;;  %v1355_v0 = vpop.permute.xlu0 %1354  ;;  %v1332_v9 = vor.u32 %v1331_v42, %v1327_v34 }
 0x157   : > { %v1641_v25 = vsel %vm1623_vm15, %v1608_v51, %v1355_v0  ;;  %v2749_v51 = vld [vmem:[#allocation3 + $0x60] sm:$0xff] }
 0x158   : > { %v1363_v32 = vpop.permute.xlu1 %1362  ;;  %v3738_v14 = vsel %vm980_vm7, %v1332_v9, %v1336_v30 }
 0x159   : > { %1438 = vrot.lane.b32.xlu2 %v3713_v13, %s2837_s9  ;;  %v1649_v60 = vsel %vm1623_vm15, %v1616_v11, %v1363_v32 }
 0x15b   : > { %v3725_v20 = vpop.permute.xlu2 %1410 }
 0x15c   : > { %1401 = vrot.lane.b32.xlu0 %v3440_v55, %s2835_s7 }
 0x15e   : > { %1430 = vrot.lane.b32.xlu1 %v3255_v12, %s2837_s9  ;;  %v1398_v10 = vpop.permute.xlu0 %1397  ;;  %v1674_v12 = vsel %vm1656_vm0, %v1641_v25, %v3654_v4 }
 0x15f   : > { %v1682_v27 = vsel %vm1656_vm0, %v1649_v60, %v1398_v10 }
 0x160   : > { %v1427_v50 = vpop.permute.xlu1 %1426  ;;  %v1715_v24 = vsel %vm1689_vm1, %v1682_v27, %v3677_v1 }
 0x161   : > { %1512 = vrot.lane.b32.xlu2 %v3424_v53, %s2838_s10  ;;  %v1707_v29 = vsel %vm1689_vm1, %v1674_v12, %v1427_v50  ;;  %v1633_v12 = vsel %vm1623_vm15, %v3669_v33, %v3711_v56 }
 0x163   : > { %v3740_v55 = vpop.permute.xlu2 %1465 }
 0x164   : > { %1477 = vrot.lane.b32.xlu0 %v3290_v57, %s2839_s11 }
 0x166   : > { %1485 = vrot.lane.b32.xlu1 %v3738_v14, %s2839_s11  ;;  %v1474_v4 = vpop.permute.xlu0 %1473 }
 0x167   : > { %v1740_v62 = vsel %vm1722_vm2, %v1707_v29, %v1474_v4 }
 0x168   : > { %v1482_v41 = vpop.permute.xlu1 %1481  ;;  %v1773_v63 = vsel %vm1755_vm3, %v1740_v62, %v3692_v3 }
 0x169   : > { %1350 = vrot.lane.b32.xlu2 %v3192_v47, %s2836_s8  ;;  %v1820_v39 = vunpack.c.l.b16 %v1773_v63  ;;  %v1821_v44 = vunpack.c.h.b16 %v1773_v63  ;;  %v1748_v3 = vsel %vm1722_vm2, %v1715_v24, %v1482_v41 }
 0x16b   : > { %v3763_v35 = vpop.permute.xlu2 %1317  ;;  %v1852_v48 = vpack.c.b16 %v1820_v39, %v1820_v39  ;;  %v1853_v0 = vpack.c.b16 %v1821_v44, %v1821_v44 }
 0x16c   : > { %1520 = vrot.lane.b32.xlu0 %v3761_v17, %s2838_s10 }
 0x16d   : > { %1917 = vst.msk [vmem:[#allocation2 + $0x40] sm:$0xf] %vm1900_vm4, %v1852_v48 }
 0x16e   : > { %1342 = vrot.lane.b32.xlu1 %v3117_v23, %s2836_s8  ;;  %1918 = vst.msk [vmem:[#allocation2 + $0x44] sm:$0xf] %vm1900_vm4, %v1853_v0  ;;  %v1517_v47 = vpop.permute.xlu0 %1516  ;;  %v2648_v0 = vld [vmem:[#allocation3 + $0xcc] sm:$0xff] }
 0x16f   : > { %v1781_v58 = vsel %vm1755_vm3, %v1748_v3, %v1517_v47 }
 0x170   : > { %v1339_v32 = vpop.permute.xlu1 %1338  ;;  %v1828_v34 = vunpack.c.l.b16 %v1781_v58  ;;  %v1829_v42 = vunpack.c.h.b16 %v1781_v58 }
 0x171   : > { %1414 = vrot.lane.b32.xlu2 %v3446_v16, %s2837_s9  ;;  %v1625_v50 = vsel %vm1623_vm15, %v3556_v26, %v1339_v32  ;;  %v1448_v32 = vshll.u32 %v2648_v0, 16 }
 0x172   : > { %v1860_v1 = vpack.c.b16 %v1828_v34, %v1828_v34  ;;  %v1861_v7 = vpack.c.b16 %v1829_v42, %v1829_v42  ;;  %v1446_v42 = vshrl.u32 %v2648_v0, 16 }
 0x173   : > { %v3777_v10 = vpop.permute.xlu2 %1391 }
 0x174   : > { %1925 = vst.msk [vmem:[#allocation2 + $0x60] sm:$0xf] %vm1900_vm4, %v1860_v1  ;;  %1377 = vrot.lane.b32.xlu0 %v3363_v46, %s2835_s7  ;;  %v1450_v1 = vrot.slane %v1448_v32, 1  ;;  %v4123_v32 = vld [vmem:[#allocation7_spill] sm:$0xff] }
 0x175   : > { %1926 = vst.msk [vmem:[#allocation2 + $0x64] sm:$0xf] %vm1900_vm4, %v1861_v7  ;;  %v2657_v23 = vld [vmem:[#allocation2 + $0x40] sm:$0xff] }
 0x176   : > { %1385 = vrot.lane.b32.xlu1 %v3372_v38, %s2835_s7  ;;  %v1374_v9 = vpop.permute.xlu0 %1373  ;;  %2617 = vmatmul.msk.bf16.vlgmr.msra.gmra.mxu2 %vm2069_vm5, %v2657_v23 }
 0x177   : > { %v1658_v11 = vsel %vm1656_vm0, %v1625_v50, %v1374_v9  ;;  %v1451_v9 = vor.u32 %v1450_v1, %v1446_v42 }
 0x178   : > { %v1382_v16 = vpop.permute.xlu1 %1381  ;;  %v1691_v26 = vsel %vm1689_vm1, %v1658_v11, %v3725_v20  ;;  %v851_v20 = vld [vmem:[#allocation3 + $0xd4] sm:$0x1] }
 0x179   : > { %1469 = vrot.lane.b32.xlu2 %v3165_v43, %s2839_s11  ;;  %v1666_v29 = vsel %vm1656_vm0, %v1633_v12, %v1382_v16  ;;  %v1443_v24 = vunpack.c.l.b16 %v851_v20  ;;  %v4121_v12 = vld [vmem:[#allocation9_spill] sm:$0xff] }
 0x17b   : > { %v3788_v30 = vpop.permute.xlu2 %1436  ;;  %v1444_v58 = vpack.c.b16 %v1443_v24, %v1443_v24 }
 0x17c   : > { %1422 = vrot.lane.b32.xlu0 %v2749_v51, %s2837_s9  ;;  %v2661_v46 = vld [vmem:[#allocation2 + $0x60] sm:$0xff] }
 0x17d   : > { %2621 = vmatmul.msk.bf16.vlgmr.msra.gmra.mxu3 %vm2069_vm5, %v2661_v46 }
 0x17e   : > { %1461 = vrot.lane.b32.xlu1 %v3030_v6, %s2839_s11  ;;  %v1419_v38 = vpop.permute.xlu0 %1418 }
 0x17f   : > { %v1699_v8 = vsel %vm1689_vm1, %v1666_v29, %v1419_v38  ;;  %v1489_v29 = vrot.slane %v2648_v0, 1 }
 0x180   : > { %v1458_v25 = vpop.permute.xlu1 %1457  ;;  %v1732_v4 = vsel %vm1722_vm2, %v1699_v8, %v3740_v55 }
 0x181   : > { %1321 = vrot.lane.b32.xlu2 %v3713_v13, %s2834_s6  ;;  %v1724_v36 = vsel %vm1722_vm2, %v1691_v26, %v1458_v25  ;;  %v1618_v25 = vsel %vm1590_vm13, %v3539_v22, %v3763_v35  ;;  %v1490_v26 = vrot.slane %v1444_v58, 1  ;;  %s3952_s6 = scalar_lea.vmem [#allocation4], %s2462_s4 }
 0x183   : > { %v3805_v60 = vpop.permute.xlu2 %1510 }
 0x184   : > { %1496 = vrot.lane.b32.xlu0 %v3351_v15, %s2838_s10 }
 0x186   : > { %1504 = vrot.lane.b32.xlu1 %v3400_v31, %s2838_s10  ;;  %v1493_v33 = vpop.permute.xlu0 %1492 }
 0x187   : > { %v1757_v56 = vsel %vm1755_vm3, %v1724_v36, %v1493_v33 }
 0x188   : > { %v1501_v13 = vpop.permute.xlu1 %1500  ;;  %v1804_v62 = vunpack.c.l.b16 %v1757_v56  ;;  %v1805_v41 = vunpack.c.h.b16 %v1757_v56 }
 0x189   : > { %v1765_v27 = vsel %vm1755_vm3, %v1732_v4, %v1501_v13  ;;  %1395 = vrot.lane.b32.xlu2 %v3424_v53, %s2835_s7  ;;  %v1491_v13 = vsel %vm1205_vm10, %v1489_v29, %v1490_v26 }
 0x18a   : > { %v1812_v63 = vunpack.c.l.b16 %v1765_v27  ;;  %v1813_v39 = vunpack.c.h.b16 %v1765_v27  ;;  %v1836_v44 = vpack.c.b16 %v1804_v62, %v1804_v62  ;;  %v1837_v48 = vpack.c.b16 %v1805_v41, %v1805_v41 }
 0x18b   : > { %v3825_v55 = vpop.permute.xlu2 %1348 }
 0x18c   : > { %v1844_v3 = vpack.c.b16 %v1812_v63, %v1812_v63  ;;  %v1845_v47 = vpack.c.b16 %v1813_v39, %v1813_v39  ;;  %1901 = vst.msk [vmem:[#allocation2] sm:$0xf] %vm1900_vm4, %v1836_v44  ;;  %1360 = vrot.lane.b32.xlu0 %v3290_v57, %s2836_s8  ;;  %v1453_v57 = vshll.u32 %v1444_v58, 16  ;;  %v1635_v42 = vsel %vm1623_vm15, %v3673_v52, %v3825_v55 }
 0x18d   : > { %1902 = vst.msk [vmem:[#allocation2 + $0x4] sm:$0xf] %vm1900_vm4, %v1837_v48 }
 0x18e   : > { %1368 = vrot.lane.b32.xlu1 %v3738_v14, %s2836_s8  ;;  %1909 = vst.msk [vmem:[#allocation2 + $0x20] sm:$0xf] %vm1900_vm4, %v1844_v3  ;;  %v1357_v53 = vpop.permute.xlu0 %1356  ;;  %v1455_v16 = vrot.slane %v1453_v57, 1 }
 0x18f   : > { %1910 = vst.msk [vmem:[#allocation2 + $0x24] sm:$0xf] %vm1900_vm4, %v1845_v47  ;;  %v1643_v50 = vsel %vm1623_vm15, %v3614_v45, %v1357_v53  ;;  %v2750_v47 = vld [vmem:[#allocation3 + $0x6c] sm:$0xff] }
 0x190   : > { %v1365_v34 = vpop.permute.xlu1 %1364  ;;  %v1456_v38 = vsel %vm980_vm7, %v1451_v9, %v1455_v16 }
 0x191   : > { %1440 = vrot.lane.b32.xlu2 %v2648_v0, %s2837_s9  ;;  %v1651_v45 = vsel %vm1623_vm15, %v1618_v25, %v1365_v34 }
 0x193   : > { %v3835_v51 = vpop.permute.xlu2 %1412 }
 0x194   : > { %1403 = vrot.lane.b32.xlu0 %v3761_v17, %s2835_s7  ;;  %v2649_v7 = vld [vmem:[#allocation2] sm:$0xff]  ;;  %v4120_v17 = vld [vmem:[#allocation11_spill] sm:$0xff] }
 0x195   : > { %2609 = vmatmul.msk.bf16.vlgmr.msra.gmra.mxu0 %vm2069_vm5, %v2649_v7 }
 0x196   : > { %1432 = vrot.lane.b32.xlu1 %v3302_v21, %s2837_s9  ;;  %v1400_v14 = vpop.permute.xlu0 %1399  ;;  %v2653_v23 = vld [vmem:[#allocation2 + $0x20] sm:$0xff]  ;;  %v1676_v21 = vsel %vm1656_vm0, %v1643_v50, %v3777_v10 }
 0x197   : > { %2613 = vmatmul.msk.bf16.vlgmr.msra.gmra.mxu1 %vm2069_vm5, %v2653_v23  ;;  %v1684_v10 = vsel %vm1656_vm0, %v1651_v45, %v1400_v14  ;;  %v4124_v23 = vld [vmem:[#allocation10_spill] sm:$0xff] }
 0x198   : > { %v1429_v46 = vpop.permute.xlu1 %1428  ;;  %v1717_v41 = vsel %vm1689_vm1, %v1684_v10, %v3788_v30 }
 0x199   : > { %1514 = vrot.lane.b32.xlu2 %v4120_v17, %s2838_s10  ;;  %v1709_v11 = vsel %vm1689_vm1, %v1676_v21, %v1429_v46 }
 0x19b   : > { %v1468_v4 = vpop.permute.xlu2 %1467 }
 0x19c   : > { %1479 = vrot.lane.b32.xlu0 %v4121_v12, %s2839_s11 }
 0x19e   : > { %1487 = vrot.lane.b32.xlu1 %v1456_v38, %s2839_s11  ;;  %v1476_v8 = vpop.permute.xlu0 %1475 }
 0x19f   : > { %v1742_v36 = vsel %vm1722_vm2, %v1709_v11, %v1476_v8 }
 0x1a0   : > { %v1484_v33 = vpop.permute.xlu1 %1483  ;;  %v1775_v22 = vsel %vm1755_vm3, %v1742_v36, %v3805_v60 }
 0x1a1   : > { %1352 = vrot.lane.b32.xlu2 %v3165_v43, %s2836_s8  ;;  %v1822_v35 = vunpack.c.l.b16 %v1775_v22  ;;  %v1823_v56 = vunpack.c.h.b16 %v1775_v22  ;;  %v1750_v27 = vsel %vm1722_vm2, %v1717_v41, %v1484_v33 }
 0x1a3   : > { %v1854_v20 = vpack.c.b16 %v1822_v35, %v1822_v35  ;;  %v1855_v62 = vpack.c.b16 %v1823_v56, %v1823_v56  ;;  %v1320_v0 = vpop.permute.xlu2 %1319 }
 0x1a4   : > { %1522 = vrot.lane.b32.xlu0 %v1491_v13, %s2838_s10  ;;  %v1620_v13 = vsel %vm1590_vm13, %v3626_v19, %v1320_v0 }
 0x1a5   : > { %1919 = vst.msk [vmem:[#allocation2 + $0x48] sm:$0xf] %vm1900_vm4, %v1854_v20 }
 0x1a6   : > { %1344 = vrot.lane.b32.xlu1 %v3030_v6, %s2836_s8  ;;  %1920 = vst.msk [vmem:[#allocation2 + $0x4c] sm:$0xf] %vm1900_vm4, %v1855_v62  ;;  %v1519_v43 = vpop.permute.xlu0 %1518 }
 0x1a7   : > { %v1783_v60 = vsel %vm1755_vm3, %v1750_v27, %v1519_v43 }
 0x1a8   : > { %v1341_v63 = vpop.permute.xlu1 %1340  ;;  %v1830_v39 = vunpack.c.l.b16 %v1783_v60  ;;  %v1831_v44 = vunpack.c.h.b16 %v1783_v60 }
 0x1a9   : > { %1416 = vrot.lane.b32.xlu2 %v3562_v18, %s2837_s9  ;;  %v4122_v18 = vld [vmem:[#allocation8_spill] sm:$0xff] }
 0x1aa   : > { %v1862_v30 = vpack.c.b16 %v1830_v39, %v1830_v39  ;;  %v1863_v48 = vpack.c.b16 %v1831_v44, %v1831_v44 }
 0x1ab   : > { %v1394_v58 = vpop.permute.xlu2 %1393 }
 0x1ac   : > { %1927 = vst.msk [vmem:[#allocation2 + $0x68] sm:$0xf] %vm1900_vm4, %v1862_v30  ;;  %1379 = vrot.lane.b32.xlu0 %v3351_v15, %s2835_s7  ;;  %v1627_v15 = vsel %vm1623_vm15, %v3647_v40, %v1341_v63 }
 0x1ad   : > { %1928 = vst.msk [vmem:[#allocation2 + $0x6c] sm:$0xf] %vm1900_vm4, %v1863_v48  ;;  %v2658_v6 = vld [vmem:[#allocation2 + $0x48] sm:$0xff] }
 0x1ae   : > { %1387 = vrot.lane.b32.xlu1 %v3400_v31, %s2835_s7  ;;  %v1376_v24 = vpop.permute.xlu0 %1375  ;;  %2618 = vmatmul.msk.bf16.gmra.mxu2 %vm2069_vm5, %v2658_v6  ;;  %s2667_s7 = sshll.u32 %s2821_s15, 8 }
 0x1af   : > { %v1660_v1 = vsel %vm1656_vm0, %v1627_v15, %v1376_v24 }
 0x1b0   : > { %v1384_v3 = vpop.permute.xlu1 %1383  ;;  %v1693_v7 = vsel %vm1689_vm1, %v1660_v1, %v3835_v51 }
 0x1b1   : > { %1471 = vrot.lane.b32.xlu2 %v4122_v18, %s2839_s11  ;;  %v1668_v57 = vsel %vm1656_vm0, %v1635_v42, %v1384_v3 }
 0x1b3   : > { %v1439_v16 = vpop.permute.xlu2 %1438 }
 0x1b4   : > { %1424 = vrot.lane.b32.xlu0 %v2750_v47, %s2837_s9  ;;  %v2662_v53 = vld [vmem:[#allocation2 + $0x68] sm:$0xff] }
 0x1b5   : > { %2622 = vmatmul.msk.bf16.gmra.mxu3 %vm2069_vm5, %v2662_v53 }
 0x1b6   : > { %1463 = vrot.lane.b32.xlu1 %v4123_v32, %s2839_s11  ;;  %v1421_v34 = vpop.permute.xlu0 %1420  ;;  %s2353_s11 = sshll.u32 %s3952_s6, 4  ;;  %s2354_s11 = int_to_ptr.vmem [resolvable:$true] %s2353_s11 }
 0x1b7   : > { %v1701_v40 = vsel %vm1689_vm1, %v1668_v57, %v1421_v34 }
 0x1b8   : > { %v1460_v31 = vpop.permute.xlu1 %1459  ;;  %v1734_v46 = vsel %vm1722_vm2, %v1701_v40, %v1468_v4 }
 0x1b9   : > { %v1726_v14 = vsel %vm1722_vm2, %v1693_v7, %v1460_v31 }
 0x1bb   : > { %v1513_v26 = vpop.permute.xlu2 %1512 }
 0x1bc   : > { %1498 = vrot.lane.b32.xlu0 %v3379_v49, %s2838_s10 }
 0x1be   : > { %1506 = vrot.lane.b32.xlu1 %v4124_v23, %s2838_s10  ;;  %v1495_v9 = vpop.permute.xlu0 %1494  ;;  %s2352_s10 = scalar_lea.hbm %s4099_s3, %s2667_s7 }
 0x1bf   : > { %v1759_v52 = vsel %vm1755_vm3, %v1726_v14, %v1495_v9  ;;  %s2355_s15 = sshll.u32 %s2352_s10, 4  ;;  %s2356_s15 = int_to_ptr.hbm [resolvable:$true] %s2355_s15 }
 0x1c0   : > { %v1503_v55 = vpop.permute.xlu1 %1502  ;;  %v1806_v50 = vunpack.c.l.b16 %v1759_v52  ;;  %v1807_v17 = vunpack.c.h.b16 %v1759_v52  ;;  %s2765_s19 = sshra.s32 %s2356_s15, 4  ;;  %s2766_s19 = int_to_ptr.hbm [resolvable:$true] %s2765_s19 }
 0x1c1   : > { %v1767_v51 = vsel %vm1755_vm3, %v1734_v46, %v1503_v55  ;;  %s2767_s21 = scalar_lea.hbm %s2766_s19, 256  ;;  %p2772_p1 = scmp.lt.s32.totalorder %s2766_s19, %s4099_s3 }
 0x1c2   : > { %v1814_v38 = vunpack.c.l.b16 %v1767_v51  ;;  %v1815_v21 = vunpack.c.h.b16 %v1767_v51  ;;  %v1838_v25 = vpack.c.b16 %v1806_v50, %v1806_v50  ;;  %v1839_v49 = vpack.c.b16 %v1807_v17, %v1807_v17  ;;  %p2768_p12 = scmp.ne.s32.totalorder %s2766_s19, %s2767_s21  ;;  %p2773_p2 = scmp.lt.s32.totalorder %s2771_s27, %s2767_s21 }
 0x1c3   : > { %v1351_v35 = vpop.permute.xlu2 %1350 }
 0x1c4   : > { %v1846_v12 = vpack.c.b16 %v1814_v38, %v1814_v38  ;;  %v1847_v11 = vpack.c.b16 %v1815_v21, %v1815_v21  ;;  %1903 = vst.msk [vmem:[#allocation2 + $0x8] sm:$0xf] %vm1900_vm4, %v1838_v25  ;;  %v1637_v7 = vsel %vm1623_vm15, %v3594_v59, %v1351_v35  ;;  %v3941_v59 = vld [vmem:[%s4098_s2] ss:$0 sm:$0xff]  ;;  %p2769_p13 = pnand %p2768_p12, %p2901_p4  ;;  %p2774_p3 = por %p2773_p2, %p2772_p1 }
 0x1c5   : > { %1904 = vst.msk [vmem:[#allocation2 + $0xc] sm:$0xf] %vm1900_vm4, %v1839_v49 }
 0x1c6   : > { %1911 = vst.msk [vmem:[#allocation2 + $0x28] sm:$0xf] %vm1900_vm4, %v1846_v12  ;;  %v1359_v45 = vpop.permute.xlu0 %1358  ;;  %p2770_p0 = pneg %p2769_p13 }
 0x1c7   : > { %1912 = vst.msk [vmem:[#allocation2 + $0x2c] sm:$0xf] %vm1900_vm4, %v1847_v11  ;;  %v1645_v22 = vsel %vm1623_vm15, %v3703_v61, %v1359_v45 }
 0x1c8   : > { %v1367_v29 = vpop.permute.xlu1 %1366  ;;  %v1678_v56 = vsel %vm1656_vm0, %v1645_v22, %v1394_v58  ;;  %p2775_p5 = pnand %p2774_p3, %p2770_p0 }
 0x1c9   : > { %v1653_v20 = vsel %vm1623_vm15, %v1620_v13, %v1367_v29 }
 0x1cb   : > { %v1415_v48 = vpop.permute.xlu2 %1414 }
 0x1cc   : > { %v2650_v8 = vld [vmem:[#allocation2 + $0x8] sm:$0xff] }
 0x1cd   : > { %2610 = vmatmul.msk.bf16.gmra.mxu0 %vm2069_vm5, %v2650_v8 }
 0x1ce   : > { %v1402_v36 = vpop.permute.xlu0 %1401  ;;  %v2654_v33 = vld [vmem:[#allocation2 + $0x28] sm:$0xff] }
 0x1cf   : > { %2614 = vmatmul.msk.bf16.gmra.mxu1 %vm2069_vm5, %v2654_v33  ;;  %v1686_v43 = vsel %vm1656_vm0, %v1653_v20, %v1402_v36 }
 0x1d0   : > { %v1431_v10 = vpop.permute.xlu1 %1430  ;;  %v1719_v30 = vsel %vm1689_vm1, %v1686_v43, %v1439_v16 }
 0x1d1   : > { %v1711_v4 = vsel %vm1689_vm1, %v1678_v56, %v1431_v10 }
 0x1d3   : > { %v1470_v32 = vpop.permute.xlu2 %1469 }
 0x1d6   : > { %v1478_v62 = vpop.permute.xlu0 %1477 }
 0x1d7   : > { %v1744_v41 = vsel %vm1722_vm2, %v1711_v4, %v1478_v62 }
 0x1d8   : > { %v1486_v27 = vpop.permute.xlu1 %1485  ;;  %v1777_v61 = vsel %vm1755_vm3, %v1744_v41, %v1513_v26 }
 0x1d9   : > { %v1824_v60 = vunpack.c.l.b16 %v1777_v61  ;;  %v1825_v63 = vunpack.c.h.b16 %v1777_v61  ;;  %v1752_v19 = vsel %vm1722_vm2, %v1719_v30, %v1486_v27 }
 0x1db   : > { %v1856_v39 = vpack.c.b16 %v1824_v60, %v1824_v60  ;;  %v1857_v44 = vpack.c.b16 %v1825_v63, %v1825_v63  ;;  %v1322_v14 = vpop.permute.xlu2 %1321 }
 0x1dd   : > { %1921 = vst.msk [vmem:[#allocation2 + $0x50] sm:$0xf] %vm1900_vm4, %v1856_v39 }
 0x1de   : > { %1922 = vst.msk [vmem:[#allocation2 + $0x54] sm:$0xf] %vm1900_vm4, %v1857_v44  ;;  %v1521_v0 = vpop.permute.xlu0 %1520 }
 0x1df   : > { %v1785_v6 = vsel %vm1755_vm3, %v1752_v19, %v1521_v0  ;;  %v1622_v0 = vsel %vm1590_vm13, %v3629_v37, %v1322_v14 }
 0x1e0   : > { %v1343_v24 = vpop.permute.xlu1 %1342  ;;  %v1832_v3 = vunpack.c.l.b16 %v1785_v6  ;;  %v1833_v18 = vunpack.c.h.b16 %v1785_v6 }
 0x1e1   : > { %v1629_v42 = vsel %vm1623_vm15, %v3651_v5, %v1343_v24 }
 0x1e2   : > { %v1864_v47 = vpack.c.b16 %v1832_v3, %v1832_v3  ;;  %v1865_v53 = vpack.c.b16 %v1833_v18, %v1833_v18 }
 0x1e3   : > { %v1396_v45 = vpop.permute.xlu2 %1395 }
 0x1e4   : > { %1929 = vst.msk [vmem:[#allocation2 + $0x70] sm:$0xf] %vm1900_vm4, %v1864_v47 }
 0x1e5   : > { %1930 = vst.msk [vmem:[#allocation2 + $0x74] sm:$0xf] %vm1900_vm4, %v1865_v53  ;;  %v2659_v15 = vld [vmem:[#allocation2 + $0x50] sm:$0xff] }
 0x1e6   : > { %v1378_v58 = vpop.permute.xlu0 %1377  ;;  %2619 = vmatmul.msk.bf16.gmra.mxu2 %vm2069_vm5, %v2659_v15 }
 0x1e7   : > { %v1662_v40 = vsel %vm1656_vm0, %v1629_v42, %v1378_v58 }
 0x1e8   : > { %v1386_v34 = vpop.permute.xlu1 %1385  ;;  %v1695_v9 = vsel %vm1689_vm1, %v1662_v40, %v1415_v48 }
 0x1e9   : > { %v1670_v23 = vsel %vm1656_vm0, %v1637_v7, %v1386_v34 }
 0x1eb   : > { %v1441_v41 = vpop.permute.xlu2 %1440 }
 0x1ec   : > { %v2663_v31 = vld [vmem:[#allocation2 + $0x70] sm:$0xff] }
 0x1ed   : > { %2623 = vmatmul.msk.bf16.gmra.mxu3 %vm2069_vm5, %v2663_v31 }
 0x1ee   : > { %v1423_v1 = vpop.permute.xlu0 %1422 }
 0x1ef   : > { %v1703_v16 = vsel %vm1689_vm1, %v1670_v23, %v1423_v1 }
 0x1f0   : > { %v1462_v57 = vpop.permute.xlu1 %1461  ;;  %v1736_v50 = vsel %vm1722_vm2, %v1703_v16, %v1470_v32 }
 0x1f1   : > { %v1728_v52 = vsel %vm1722_vm2, %v1695_v9, %v1462_v57 }
 0x1f6   : > { %v1497_v5 = vpop.permute.xlu0 %1496 }
 0x1f7   : > { %v1761_v55 = vsel %vm1755_vm3, %v1728_v52, %v1497_v5 }
 0x1f8   : > { %v1505_v46 = vpop.permute.xlu1 %1504  ;;  %v1808_v17 = vunpack.c.l.b16 %v1761_v55  ;;  %v1809_v51 = vunpack.c.h.b16 %v1761_v55 }
 0x1f9   : > { %v1769_v38 = vsel %vm1755_vm3, %v1736_v50, %v1505_v46  ;;  %v2171_v11 = vpop.f32.mrf.mxu2 }
 0x1fa   : > { %v1816_v21 = vunpack.c.l.b16 %v1769_v38  ;;  %v1817_v25 = vunpack.c.h.b16 %v1769_v38  ;;  %v1840_v49 = vpack.c.b16 %v1808_v17, %v1808_v17  ;;  %v1841_v12 = vpack.c.b16 %v1809_v51, %v1809_v51 }
 0x1fb   : > { %v2172_v29 = vadd.f32 %v3941_v59, %v2171_v11 }
 0x1fc   : > { %v1848_v26 = vpack.c.b16 %v1816_v21, %v1816_v21  ;;  %v1849_v8 = vpack.c.b16 %v1817_v25, %v1817_v25  ;;  %1905 = vst.msk [vmem:[#allocation2 + $0x10] sm:$0xf] %vm1900_vm4, %v1840_v49 }
 0x1fd   : > { %1906 = vst.msk [vmem:[#allocation2 + $0x14] sm:$0xf] %vm1900_vm4, %v1841_v12  ;;  %vm2227_vm6 = vcmp.ge.f32.partialorder %v2172_v29, 0.0  ;;  %v2259_v36 = vmul.f32 0.01, %v2172_v29 }
 0x1fe   : > { %1913 = vst.msk [vmem:[#allocation2 + $0x30] sm:$0xf] %vm1900_vm4, %v1848_v26  ;;  %v1361_v33 = vpop.permute.xlu0 %1360 }
 0x1ff   : > { %v2291_v10 = vsel %vm2227_vm6, %v2172_v29, %v2259_v36  ;;  %1914 = vst.msk [vmem:[#allocation2 + $0x34] sm:$0xf] %vm1900_vm4, %v1849_v8  ;;  %v1647_v44 = vsel %vm1623_vm15, %v3707_v2, %v1361_v33  ;;  %v1515_v2 = vpop.permute.xlu2 %1514 }
 0x200   : > { %v1369_v22 = vpop.permute.xlu1 %1368  ;;  %2323 = vst [vmem:[%s3952_s6 + $0x80] sm:$0xff] %v2291_v10  ;;  %v2191_v35 = vpop.f32.mrf.mxu3  ;;  %v1680_v48 = vsel %vm1656_vm0, %v1647_v44, %v1396_v45 }
 0x201   : > { %v2192_v56 = vadd.f32 %v3941_v59, %v2191_v35  ;;  %v2173_v13 = vpop.f32.mrf.mxu2  ;;  %v1655_v3 = vsel %vm1623_vm15, %v1622_v0, %v1369_v22 }
 0x202   : > { %v2174_v4 = vadd.f32 %v3941_v59, %v2173_v13 }
 0x203   : > { %vm2235_vm7 = vcmp.ge.f32.partialorder %v2192_v56, 0.0  ;;  %v2267_v20 = vmul.f32 0.01, %v2192_v56 }
 0x204   : > { %v2651_v62 = vld [vmem:[#allocation2 + $0x10] sm:$0xff]  ;;  %vm2228_vm8 = vcmp.ge.f32.partialorder %v2174_v4, 0.0  ;;  %v2260_v27 = vmul.f32 0.01, %v2174_v4 }
 0x205   : > { %v2299_v43 = vsel %vm2235_vm7, %v2192_v56, %v2267_v20  ;;  %2611 = vmatmul.msk.bf16.gmra.mxu0 %vm2069_vm5, %v2651_v62 }
 0x206   : > { %v1404_v61 = vpop.permute.xlu0 %1403  ;;  %v2655_v60 = vld [vmem:[#allocation2 + $0x30] sm:$0xff]  ;;  %2331 = vst [vmem:[%s3952_s6 + $0xc0] sm:$0xff] %v2299_v43  ;;  %v2292_v63 = vsel %vm2228_vm8, %v2174_v4, %v2260_v27 }
 0x207   : > { %2324 = vst [vmem:[%s3952_s6 + $0x88] sm:$0xff] %v2292_v63  ;;  %2615 = vmatmul.msk.bf16.gmra.mxu1 %vm2069_vm5, %v2655_v60  ;;  %v1688_v58 = vsel %vm1656_vm0, %v1655_v3, %v1404_v61  ;;  %v1353_v51 = vpop.permute.xlu2 %1352 }
 0x208   : > { %v1433_v39 = vpop.permute.xlu1 %1432  ;;  %v2193_v30 = vpop.f32.mrf.mxu3  ;;  %v1721_v57 = vsel %vm1689_vm1, %v1688_v58, %v1441_v41  ;;  %v1639_v62 = vsel %vm1623_vm15, %v3688_v28, %v1353_v51 }
 0x209   : > { %v2194_v19 = vadd.f32 %v3941_v59, %v2193_v30  ;;  %v1713_v24 = vsel %vm1689_vm1, %v1680_v48, %v1433_v39 }
 0x20b   : > { %vm2236_vm9 = vcmp.ge.f32.partialorder %v2194_v19, 0.0  ;;  %v2268_v6 = vmul.f32 0.01, %v2194_v19 }
 0x20d   : > { %v2300_v18 = vsel %vm2236_vm9, %v2194_v19, %v2268_v6 }
 0x20e   : > { %v1480_v47 = vpop.permute.xlu0 %1479  ;;  %2332 = vst [vmem:[%s3952_s6 + $0xc8] sm:$0xff] %v2300_v18 }
 0x20f   : > { %v1746_v53 = vsel %vm1722_vm2, %v1713_v24, %v1480_v47  ;;  %v1417_v22 = vpop.permute.xlu2 %1416 }
 0x210   : > { %v1488_v15 = vpop.permute.xlu1 %1487  ;;  %v1779_v32 = vsel %vm1755_vm3, %v1746_v53, %v1515_v2 }
 0x211   : > { %v1826_v34 = vunpack.c.l.b16 %v1779_v32  ;;  %v1827_v31 = vunpack.c.h.b16 %v1779_v32  ;;  %v1754_v40 = vsel %vm1722_vm2, %v1721_v57, %v1488_v15 }
 0x212   : > { %v2131_v1 = vpop.f32.mrf.mxu0 }
 0x213   : > { %v1858_v37 = vpack.c.b16 %v1826_v34, %v1826_v34  ;;  %v1859_v42 = vpack.c.b16 %v1827_v31, %v1827_v31  ;;  %v2132_v7 = vadd.f32 %v3941_v59, %v2131_v1 }
 0x214   : > { %v2151_v14 = vpop.f32.mrf.mxu1 }
 0x215   : > { %1923 = vst.msk [vmem:[#allocation2 + $0x58] sm:$0xf] %vm1900_vm4, %v1858_v37  ;;  %vm2211_vm10 = vcmp.ge.f32.partialorder %v2132_v7, 0.0  ;;  %v2243_v23 = vmul.f32 0.01, %v2132_v7  ;;  %v2152_v16 = vadd.f32 %v3941_v59, %v2151_v14 }
 0x216   : > { %1924 = vst.msk [vmem:[#allocation2 + $0x5c] sm:$0xf] %vm1900_vm4, %v1859_v42  ;;  %v1523_v9 = vpop.permute.xlu0 %1522 }
 0x217   : > { %v1787_v52 = vsel %vm1755_vm3, %v1754_v40, %v1523_v9  ;;  %v2275_v55 = vsel %vm2211_vm10, %v2132_v7, %v2243_v23  ;;  %vm2219_vm11 = vcmp.ge.f32.partialorder %v2152_v16, 0.0  ;;  %v2251_v17 = vmul.f32 0.01, %v2152_v16  ;;  %v1472_v60 = vpop.permute.xlu2 %1471 }
 0x218   : > { %v1345_v5 = vpop.permute.xlu1 %1344  ;;  %v1834_v46 = vunpack.c.l.b16 %v1787_v52  ;;  %v1835_v50 = vunpack.c.h.b16 %v1787_v52  ;;  %2307 = vst [vmem:[%s3952_s6] sm:$0xff] %v2275_v55 }
 0x219   : > { %v2283_v25 = vsel %vm2219_vm11, %v2152_v16, %v2251_v17  ;;  %v1631_v13 = vsel %vm1623_vm15, %v3576_v54, %v1345_v5 }
 0x21a   : > { %v1866_v38 = vpack.c.b16 %v1834_v46, %v1834_v46  ;;  %v1867_v21 = vpack.c.b16 %v1835_v50, %v1835_v50  ;;  %v2133_v49 = vpop.f32.mrf.mxu0  ;;  %2315 = vst [vmem:[%s3952_s6 + $0x40] sm:$0xff] %v2283_v25 }
 0x21b   : > { %v2134_v12 = vadd.f32 %v3941_v59, %v2133_v49 }
 0x21c   : > { %1931 = vst.msk [vmem:[#allocation2 + $0x78] sm:$0xf] %vm1900_vm4, %v1866_v38  ;;  %v2153_v45 = vpop.f32.mrf.mxu1 }
 0x21d   : > { %1932 = vst.msk [vmem:[#allocation2 + $0x7c] sm:$0xf] %vm1900_vm4, %v1867_v21  ;;  %v2660_v11 = vld [vmem:[#allocation2 + $0x58] sm:$0xff]  ;;  %vm2212_vm12 = vcmp.ge.f32.partialorder %v2134_v12, 0.0  ;;  %v2244_v29 = vmul.f32 0.01, %v2134_v12  ;;  %v2154_v8 = vadd.f32 %v3941_v59, %v2153_v45 }
 0x21e   : > { %v1380_v26 = vpop.permute.xlu0 %1379  ;;  %2620 = vmatmul.msk.bf16.gmra.mxu2 %vm2069_vm5, %v2660_v11 }
 0x21f   : > { %v2276_v33 = vsel %vm2212_vm12, %v2134_v12, %v2244_v29  ;;  %vm2220_vm13 = vcmp.ge.f32.partialorder %v2154_v8, 0.0  ;;  %v2252_v10 = vmul.f32 0.01, %v2154_v8  ;;  %v1664_v41 = vsel %vm1656_vm0, %v1631_v13, %v1380_v26 }
 0x220   : > { %v1388_v36 = vpop.permute.xlu1 %1387  ;;  %2308 = vst [vmem:[%s3952_s6 + $0x8] sm:$0xff] %v2276_v33  ;;  %v1697_v43 = vsel %vm1689_vm1, %v1664_v41, %v1417_v22 }
 0x221   : > { %v2284_v35 = vsel %vm2220_vm13, %v2154_v8, %v2252_v10  ;;  %v1672_v27 = vsel %vm1656_vm0, %v1639_v62, %v1388_v36 }
 0x222   : > { %2316 = vst [vmem:[%s3952_s6 + $0x48] sm:$0xff] %v2284_v35 }
 0x224   : > { %v2664_v56 = vld [vmem:[#allocation2 + $0x78] sm:$0xff] }
 0x225   : > { %2624 = vmatmul.msk.bf16.gmra.mxu3 %vm2069_vm5, %v2664_v56 }
 0x226   : > { %v1425_v4 = vpop.permute.xlu0 %1424 }
 0x227   : > { %v1705_v61 = vsel %vm1689_vm1, %v1672_v27, %v1425_v4 }
 0x228   : > { %v1464_v20 = vpop.permute.xlu1 %1463  ;;  %v1738_v54 = vsel %vm1722_vm2, %v1705_v61, %v1472_v60 }
 0x229   : > { %v1730_v63 = vsel %vm1722_vm2, %v1697_v43, %v1464_v20 }
 0x22e   : > { %v1499_v39 = vpop.permute.xlu0 %1498 }
 0x22f   : > { %v1763_v44 = vsel %vm1755_vm3, %v1730_v63, %v1499_v39 }
 0x230   : > { %v1507_v30 = vpop.permute.xlu1 %1506  ;;  %v1810_v19 = vunpack.c.l.b16 %v1763_v44  ;;  %v1811_v48 = vunpack.c.h.b16 %v1763_v44 }
 0x231   : > { %v1771_v28 = vsel %vm1755_vm3, %v1738_v54, %v1507_v30  ;;  %v2176_v18 = vpop.f32.mrf.mxu2 }
 0x232   : > { %v1818_v0 = vunpack.c.l.b16 %v1771_v28  ;;  %v1819_v6 = vunpack.c.h.b16 %v1771_v28  ;;  %v1842_v24 = vpack.c.b16 %v1810_v19, %v1810_v19  ;;  %v1843_v3 = vpack.c.b16 %v1811_v48, %v1811_v48 }
 0x233   : > { %v2177_v47 = vadd.f32 %v3941_v59, %v2176_v18 }
 0x234   : > { %v1850_v2 = vpack.c.b16 %v1818_v0, %v1818_v0  ;;  %v1851_v53 = vpack.c.b16 %v1819_v6, %v1819_v6  ;;  %1907 = vst.msk [vmem:[#allocation2 + $0x18] sm:$0xf] %vm1900_vm4, %v1842_v24 }
 0x235   : > { %1908 = vst.msk [vmem:[#allocation2 + $0x1c] sm:$0xf] %vm1900_vm4, %v1843_v3  ;;  %vm2229_vm14 = vcmp.ge.f32.partialorder %v2177_v47, 0.0  ;;  %v2261_v15 = vmul.f32 0.01, %v2177_v47 }
 0x236   : > { %1915 = vst.msk [vmem:[#allocation2 + $0x38] sm:$0xf] %vm1900_vm4, %v1850_v2 }
 0x237   : > { %v2293_v58 = vsel %vm2229_vm14, %v2177_v47, %v2261_v15  ;;  %1916 = vst.msk [vmem:[#allocation2 + $0x3c] sm:$0xf] %vm1900_vm4, %v1851_v53 }
 0x238   : > { %2325 = vst [vmem:[%s3952_s6 + $0x90] sm:$0xff] %v2293_v58  ;;  %v2196_v32 = vpop.f32.mrf.mxu3 }
 0x239   : > { %v2197_v34 = vadd.f32 %v3941_v59, %v2196_v32  ;;  %v2178_v31 = vpop.f32.mrf.mxu2 }
 0x23a   : > { %v2179_v37 = vadd.f32 %v3941_v59, %v2178_v31 }
 0x23b   : > { %vm2237_vm15 = vcmp.ge.f32.partialorder %v2197_v34, 0.0  ;;  %v2269_v42 = vmul.f32 0.01, %v2197_v34 }
 0x23c   : > { %v2652_v1 = vld [vmem:[#allocation2 + $0x18] sm:$0xff]  ;;  %vm2230_vm0 = vcmp.ge.f32.partialorder %v2179_v37, 0.0  ;;  %v2262_v57 = vmul.f32 0.01, %v2179_v37 }
 0x23d   : > { %v2301_v7 = vsel %vm2237_vm15, %v2197_v34, %v2269_v42  ;;  %2612 = vmatmul.msk.bf16.gmra.mxu0 %vm2069_vm5, %v2652_v1 }
 0x23e   : > { %v2656_v40 = vld [vmem:[#allocation2 + $0x38] sm:$0xff]  ;;  %2333 = vst [vmem:[%s3952_s6 + $0xd0] sm:$0xff] %v2301_v7  ;;  %v2294_v14 = vsel %vm2230_vm0, %v2179_v37, %v2262_v57 }
 0x23f   : > { %2326 = vst [vmem:[%s3952_s6 + $0x98] sm:$0xff] %v2294_v14  ;;  %2616 = vmatmul.msk.bf16.gmra.mxu1 %vm2069_vm5, %v2656_v40 }
 0x240   : > { %v2198_v23 = vpop.f32.mrf.mxu3 }
 0x241   : > { %v2199_v9 = vadd.f32 %v3941_v59, %v2198_v23 }
 0x243   : > { %vm2238_vm1 = vcmp.ge.f32.partialorder %v2199_v9, 0.0  ;;  %v2270_v16 = vmul.f32 0.01, %v2199_v9 }
 0x245   : > { %v2302_v52 = vsel %vm2238_vm1, %v2199_v9, %v2270_v16 }
 0x246   : > { %2334 = vst [vmem:[%s3952_s6 + $0xd8] sm:$0xff] %v2302_v52 }
 0x24a   : > { %v2136_v5 = vpop.f32.mrf.mxu0 }
 0x24b   : > { %v2137_v55 = vadd.f32 %v3941_v59, %v2136_v5 }
 0x24c   : > { %v2156_v46 = vpop.f32.mrf.mxu1 }
 0x24d   : > { %vm2213_vm2 = vcmp.ge.f32.partialorder %v2137_v55, 0.0  ;;  %v2245_v50 = vmul.f32 0.01, %v2137_v55  ;;  %v2157_v17 = vadd.f32 %v3941_v59, %v2156_v46 }
 0x24f   : > { %v2277_v51 = vsel %vm2213_vm2, %v2137_v55, %v2245_v50  ;;  %vm2221_vm3 = vcmp.ge.f32.partialorder %v2157_v17, 0.0  ;;  %v2253_v38 = vmul.f32 0.01, %v2157_v17 }
 0x250   : > { %2309 = vst [vmem:[%s3952_s6 + $0x10] sm:$0xff] %v2277_v51 }
 0x251   : > { %v2285_v21 = vsel %vm2221_vm3, %v2157_v17, %v2253_v38 }
 0x252   : > { %2317 = vst [vmem:[%s3952_s6 + $0x50] sm:$0xff] %v2285_v21  ;;  %v2138_v25 = vpop.f32.mrf.mxu0 }
 0x253   : > { %v2139_v49 = vadd.f32 %v3941_v59, %v2138_v25 }
 0x254   : > { %v2158_v12 = vpop.f32.mrf.mxu1 }
 0x255   : > { %vm2214_vm4 = vcmp.ge.f32.partialorder %v2139_v49, 0.0  ;;  %v2246_v11 = vmul.f32 0.01, %v2139_v49  ;;  %v2159_v45 = vadd.f32 %v3941_v59, %v2158_v12 }
 0x257   : > { %v2278_v29 = vsel %vm2214_vm4, %v2139_v49, %v2246_v11  ;;  %vm2222_vm5 = vcmp.ge.f32.partialorder %v2159_v45, 0.0  ;;  %v2254_v26 = vmul.f32 0.01, %v2159_v45 }
 0x258   : > { %2310 = vst [vmem:[%s3952_s6 + $0x18] sm:$0xff] %v2278_v29 }
 0x259   : > { %v2286_v8 = vsel %vm2222_vm5, %v2159_v45, %v2254_v26 }
 0x25a   : > { %2318 = vst [vmem:[%s3952_s6 + $0x58] sm:$0xff] %v2286_v8 }
 0x269   : > { %v2181_v36 = vpop.f32.mrf.mxu2 }
 0x26a   : > { %v2182_v33 = vadd.f32 %v3941_v59, %v2181_v36 }
 0x26c   : > { %vm2231_vm6 = vcmp.ge.f32.partialorder %v2182_v33, 0.0  ;;  %v2263_v10 = vmul.f32 0.01, %v2182_v33 }
 0x26e   : > { %v2295_v22 = vsel %vm2231_vm6, %v2182_v33, %v2263_v10 }
 0x26f   : > { %2327 = vst [vmem:[%s3952_s6 + $0xa0] sm:$0xff] %v2295_v22 }
 0x270   : > { %v2201_v35 = vpop.f32.mrf.mxu3 }
 0x271   : > { %v2202_v56 = vadd.f32 %v3941_v59, %v2201_v35  ;;  %v2183_v13 = vpop.f32.mrf.mxu2 }
 0x272   : > { %v2184_v4 = vadd.f32 %v3941_v59, %v2183_v13 }
 0x273   : > { %vm2239_vm7 = vcmp.ge.f32.partialorder %v2202_v56, 0.0  ;;  %v2271_v20 = vmul.f32 0.01, %v2202_v56 }
 0x274   : > { %vm2232_vm8 = vcmp.ge.f32.partialorder %v2184_v4, 0.0  ;;  %v2264_v62 = vmul.f32 0.01, %v2184_v4 }
 0x275   : > { %v2303_v41 = vsel %vm2239_vm7, %v2202_v56, %v2271_v20 }
 0x276   : > { %2335 = vst [vmem:[%s3952_s6 + $0xe0] sm:$0xff] %v2303_v41  ;;  %v2296_v27 = vsel %vm2232_vm8, %v2184_v4, %v2264_v62 }
 0x277   : > { %2328 = vst [vmem:[%s3952_s6 + $0xa8] sm:$0xff] %v2296_v27 }
 0x278   : > { %v2203_v43 = vpop.f32.mrf.mxu3 }
 0x279   : > { %v2204_v61 = vadd.f32 %v3941_v59, %v2203_v43 }
 0x27b   : > { %vm2240_vm9 = vcmp.ge.f32.partialorder %v2204_v61, 0.0  ;;  %v2272_v60 = vmul.f32 0.01, %v2204_v61 }
 0x27d   : > { %v2304_v63 = vsel %vm2240_vm9, %v2204_v61, %v2272_v60 }
 0x27e   : > { %2336 = vst [vmem:[%s3952_s6 + $0xe8] sm:$0xff] %v2304_v63 }
 0x282   : > { %v2141_v39 = vpop.f32.mrf.mxu0 }
 0x283   : > { %v2142_v54 = vadd.f32 %v3941_v59, %v2141_v39 }
 0x284   : > { %v2161_v44 = vpop.f32.mrf.mxu1 }
 0x285   : > { %vm2215_vm10 = vcmp.ge.f32.partialorder %v2142_v54, 0.0  ;;  %v2247_v30 = vmul.f32 0.01, %v2142_v54  ;;  %v2162_v19 = vadd.f32 %v3941_v59, %v2161_v44 }
 0x287   : > { %v2279_v48 = vsel %vm2215_vm10, %v2142_v54, %v2247_v30  ;;  %vm2223_vm11 = vcmp.ge.f32.partialorder %v2162_v19, 0.0  ;;  %v2255_v28 = vmul.f32 0.01, %v2162_v19 }
 0x288   : > { %2311 = vst [vmem:[%s3952_s6 + $0x20] sm:$0xff] %v2279_v48 }
 0x289   : > { %v2287_v0 = vsel %vm2223_vm11, %v2162_v19, %v2255_v28 }
 0x28a   : > { %2319 = vst [vmem:[%s3952_s6 + $0x60] sm:$0xff] %v2287_v0  ;;  %v2143_v6 = vpop.f32.mrf.mxu0 }
 0x28b   : > { %v2144_v24 = vadd.f32 %v3941_v59, %v2143_v6 }
 0x28c   : > { %v2163_v3 = vpop.f32.mrf.mxu1 }
 0x28d   : > { %vm2216_vm12 = vcmp.ge.f32.partialorder %v2144_v24, 0.0  ;;  %v2248_v18 = vmul.f32 0.01, %v2144_v24  ;;  %v2164_v47 = vadd.f32 %v3941_v59, %v2163_v3 }
 0x28f   : > { %v2280_v2 = vsel %vm2216_vm12, %v2144_v24, %v2248_v18  ;;  %vm2224_vm13 = vcmp.ge.f32.partialorder %v2164_v47, 0.0  ;;  %v2256_v53 = vmul.f32 0.01, %v2164_v47 }
 0x290   : > { %2312 = vst [vmem:[%s3952_s6 + $0x28] sm:$0xff] %v2280_v2 }
 0x291   : > { %v2288_v15 = vsel %vm2224_vm13, %v2164_v47, %v2256_v53 }
 0x292   : > { %2320 = vst [vmem:[%s3952_s6 + $0x68] sm:$0xff] %v2288_v15 }
 0x2a1   : > { %v2186_v58 = vpop.f32.mrf.mxu2 }
 0x2a2   : > { %v2187_v32 = vadd.f32 %v3941_v59, %v2186_v58 }
 0x2a4   : > { %vm2233_vm14 = vcmp.ge.f32.partialorder %v2187_v32, 0.0  ;;  %v2265_v34 = vmul.f32 0.01, %v2187_v32 }
 0x2a6   : > { %v2297_v31 = vsel %vm2233_vm14, %v2187_v32, %v2265_v34 }
 0x2a7   : > { %2329 = vst [vmem:[%s3952_s6 + $0xb0] sm:$0xff] %v2297_v31 }
 0x2a8   : > { %v2206_v37 = vpop.f32.mrf.mxu3 }
 0x2a9   : > { %v2207_v42 = vadd.f32 %v3941_v59, %v2206_v37  ;;  %v2188_v1 = vpop.f32.mrf.mxu2 }
 0x2aa   : > { %v2189_v57 = vadd.f32 %v3941_v59, %v2188_v1 }
 0x2ab   : > { %vm2241_vm15 = vcmp.ge.f32.partialorder %v2207_v42, 0.0  ;;  %v2273_v7 = vmul.f32 0.01, %v2207_v42 }
 0x2ac   : > { %vm2234_vm0 = vcmp.ge.f32.partialorder %v2189_v57, 0.0  ;;  %v2266_v40 = vmul.f32 0.01, %v2189_v57 }
 0x2ad   : > { %v2305_v14 = vsel %vm2241_vm15, %v2207_v42, %v2273_v7 }
 0x2ae   : > { %2337 = vst [vmem:[%s3952_s6 + $0xf0] sm:$0xff] %v2305_v14  ;;  %v2298_v23 = vsel %vm2234_vm0, %v2189_v57, %v2266_v40 }
 0x2af   : > { %2330 = vst [vmem:[%s3952_s6 + $0xb8] sm:$0xff] %v2298_v23 }
 0x2b0   : > { %v2208_v9 = vpop.f32.mrf.mxu3 }
 0x2b1   : > { %v2209_v16 = vadd.f32 %v3941_v59, %v2208_v9 }
 0x2b3   : > { %vm2242_vm1 = vcmp.ge.f32.partialorder %v2209_v16, 0.0  ;;  %v2274_v52 = vmul.f32 0.01, %v2209_v16 }
 0x2b5   : > { %v2306_v5 = vsel %vm2242_vm1, %v2209_v16, %v2274_v52 }
 0x2b6   : > { %2338 = vst [vmem:[%s3952_s6 + $0xf8] sm:$0xff] %v2306_v5 }
 0x2ba   : > { %v2146_v55 = vpop.f32.mrf.mxu0 }
 0x2bb   : > { %v2147_v46 = vadd.f32 %v3941_v59, %v2146_v55 }
 0x2bc   : > { %v2166_v50 = vpop.f32.mrf.mxu1 }
 0x2bd   : > { %vm2217_vm2 = vcmp.ge.f32.partialorder %v2147_v46, 0.0  ;;  %v2249_v17 = vmul.f32 0.01, %v2147_v46  ;;  %v2167_v51 = vadd.f32 %v3941_v59, %v2166_v50 }
 0x2bf   : > { %v2281_v38 = vsel %vm2217_vm2, %v2147_v46, %v2249_v17  ;;  %vm2225_vm3 = vcmp.ge.f32.partialorder %v2167_v51, 0.0  ;;  %v2257_v21 = vmul.f32 0.01, %v2167_v51 }
 0x2c0   : > { %2313 = vst [vmem:[%s3952_s6 + $0x30] sm:$0xff] %v2281_v38 }
 0x2c1   : > { %v2289_v25 = vsel %vm2225_vm3, %v2167_v51, %v2257_v21 }
 0x2c2   : > { %2321 = vst [vmem:[%s3952_s6 + $0x70] sm:$0xff] %v2289_v25  ;;  %v2148_v49 = vpop.f32.mrf.mxu0 }
 0x2c3   : > { %v2149_v12 = vadd.f32 %v3941_v59, %v2148_v49 }
 0x2c4   : > { %v2168_v11 = vpop.f32.mrf.mxu1 }
 0x2c5   : > { %vm2218_vm4 = vcmp.ge.f32.partialorder %v2149_v12, 0.0  ;;  %v2250_v45 = vmul.f32 0.01, %v2149_v12  ;;  %v2169_v29 = vadd.f32 %v3941_v59, %v2168_v11 }
 0x2c7   : > { %v2282_v26 = vsel %vm2218_vm4, %v2149_v12, %v2250_v45  ;;  %vm2226_vm5 = vcmp.ge.f32.partialorder %v2169_v29, 0.0  ;;  %v2258_v8 = vmul.f32 0.01, %v2169_v29 }
 0x2c8   : > { %2314 = vst [vmem:[%s3952_s6 + $0x38] sm:$0xff] %v2282_v26 }
 0x2c9   : > { %v2290_v36 = vsel %vm2226_vm5, %v2169_v29, %v2258_v8 }
 0x2ca   : > { %2322 = vst [vmem:[%s3952_s6 + $0x78] sm:$0xff] %v2290_v36 }
 0x2cb   : > { %2778 = shalt.err (!%p2775_p5)
}
 0x2cc   : > { %s2840_s28 = smov 128  }
 0x2cd   : > { %2677 = dma.vmem_to_hbm [thread:$0]  (%p2901_p4), %s2354_s11, 4096, %s2356_s15, %s2340_s18, %s2840_s28, %s2840_s28, %s2833_s5  }
 0x2ce PF: > { %p2683_p6 = scmp.ge.s32.totalorder %s2829_s17, 2  ;;  %s2370_s4 = sand.u32 1, %s2809_s12  }
 0x2cf   : > { %s2371_s6 = scalar_lea.sflag [#allocation5], %s2370_s4 }
 0x2d0   : > { %p2680_p7 = pnand %p2683_p6, %p2908_p8 }
 0x2d2   : > { %p2681_p9 = pneg %p2680_p7 }
 0x2d4   : > { %2804 = dma.done.wait (%p2681_p9), %s2371_s6, 4096  }
 0x2d5   : > { %2806 = vsyncadd (%p2681_p9), %s2371_s6, 4294963200  ;;  %s16_s17 = sadd.s32 1, %s2829_s17   ;;  %s4125_s12 = smov %s2813_s13 }
 0x2d6   : > { %p13_p10 = scmp.ge.s32.totalorder %s16_s17, 4   ;;  %s4126_s13 = smov %s2817_s14 }
 0x2d7   : > { %s4127_s14 = smov %s2914_s25  ;;  %s4128_s15 = smov %s2825_s16 }
 0x2d8   : > { %s4129_s16 = smov %s4131_s20  ;;  %15 = sbr.rel (!%p13_p10) target bundleno = 4 (0x4), region = 79 }
 0x2dd   :  { %2377 = vsyncpa [#allocation5], 1 }
 0x2de   :  { %2379 = vsyncpa [#allocation5 + $0x1], 1 }

</bundles_post_ra>
